<compile_context>
chip_gen: v7x
topology: tpu7x:2x2x1
jax: 0.10.0
libtpu: 0.0.40
codegen_flags: <defaults>
</compile_context>

<pallas_src>
import numpy as np
import jax
import jax.numpy as jnp
from jax.experimental import pallas as pl
from jax.experimental.pallas import tpu as pltpu

# ---------------- small GPT-NeoX-like config ----------------
VOCAB = 256
HIDDEN = 128
NUM_HEADS = 4
HEAD_SIZE = HIDDEN // NUM_HEADS            # 32
INTERMEDIATE = 4 * HIDDEN                  # 512
NUM_LAYERS = 2
ROTARY_PCT = 0.25
ROTARY_DIM = int(HEAD_SIZE * ROTARY_PCT)   # 8 (even, as asserted in the module)
HALF_ROT = ROTARY_DIM // 2                 # 4
ROPE_THETA = 10000.0
LN_EPS = 1e-5
SEQ = 8

PACK_W = 512       # lane width of the packed small-parameter array
PACK_ROWS = 10     # ln1w ln1b ln2w ln2b bqkv bo b1 b2 final_ln_w final_ln_b

assert ROTARY_DIM % 2 == 0


# ---------------- in-kernel helpers ----------------
def _layernorm(x, w, b):
    mu = jnp.mean(x, axis=-1, keepdims=True)
    xc = x - mu
    var = jnp.mean(xc * xc, axis=-1, keepdims=True)
    return xc * jax.lax.rsqrt(var + LN_EPS) * w + b


def _apply_rope(x, cos, sin_lo, sin_hi):
    # GPT-NeoX partial rotary via lane rotations (XLU) instead of a permutation matmul.
    #   lanes with d_in_head <  HALF_ROT need        -x[lane + HALF_ROT] * sin
    #   lanes with HALF_ROT <= d_in_head < ROT need  +x[lane - HALF_ROT] * sin
    # sin_lo / sin_hi already carry the sign and are zero everywhere else,
    # cos is 1 on the non-rotary (pass-through) lanes.
    x_up = pltpu.roll(x, shift=HIDDEN - HALF_ROT, axis=1)   # x[lane + HALF_ROT]
    x_dn = pltpu.roll(x, shift=HALF_ROT, axis=1)            # x[lane - HALF_ROT]
    return x * cos + x_up * sin_lo + x_dn * sin_hi


# ---------------- fused whole-model kernel (grid over layers) ----------------
def gpt_neox_fused_kernel(h0_ref, rope_ref, small_ref,
                          wqkv_ref, wo_ref, w1_ref, w2_ref,
                          out_ref, h_scratch):
    l = pl.program_id(0)
    scale = HEAD_SIZE ** -0.5

    @pl.when(l == 0)
    def _():
        h_scratch[...] = h0_ref[...]          # load residual stream once

    h = h_scratch[...]                        # [S, H], resident in VMEM across layers

    # -------- unpack the single small-parameter block for this layer --------
    sp = small_ref[0]                         # [PACK_ROWS, PACK_W]
    ln1w = sp[0:1, 0:HIDDEN]
    ln1b = sp[1:2, 0:HIDDEN]
    ln2w = sp[2:3, 0:HIDDEN]
    ln2b = sp[3:4, 0:HIDDEN]
    bqkv = sp[4:5, 0:3 * HIDDEN]
    bo   = sp[5:6, 0:HIDDEN]
    b1   = sp[6:7, 0:INTERMEDIATE]
    b2   = sp[7:8, 0:HIDDEN]
    finw = sp[8:9, 0:HIDDEN]
    finb = sp[9:10, 0:HIDDEN]

    cos    = rope_ref[0]                      # [S, H]
    sin_lo = rope_ref[1]
    sin_hi = rope_ref[2]

    # ---- attention branch: input_layernorm -> fused qkv -> rope -> attn -> dense ----
    x = _layernorm(h, ln1w, ln1b)
    qkv = jnp.dot(x, wqkv_ref[0], preferred_element_type=jnp.float32) + bqkv
    q = qkv[:, 0:HIDDEN]
    k = qkv[:, HIDDEN:2 * HIDDEN]
    v = qkv[:, 2 * HIDDEN:3 * HIDDEN]

    q = _apply_rope(q, cos, sin_lo, sin_hi)
    k = _apply_rope(k, cos, sin_lo, sin_hi)

    # causal multi-head attention (prefill path; empty KV cache)
    # TODO(synk): paged KV-cache read/write (InputMetadata / block tables / cache
    # events) from PagedAttentionWithRoPE is serving machinery and is not reproduced.
    q3 = jnp.transpose(q.reshape(SEQ, NUM_HEADS, HEAD_SIZE), (1, 0, 2))  # [nh,S,hd]
    k3 = jnp.transpose(k.reshape(SEQ, NUM_HEADS, HEAD_SIZE), (1, 0, 2))
    v3 = jnp.transpose(v.reshape(SEQ, NUM_HEADS, HEAD_SIZE), (1, 0, 2))

    scores = jnp.einsum('hqd,hkd->hqk', q3, k3,
                        preferred_element_type=jnp.float32) * scale      # [nh,S,S]
    row = jax.lax.broadcasted_iota(jnp.int32, (NUM_HEADS, SEQ, SEQ), 1)
    col = jax.lax.broadcasted_iota(jnp.int32, (NUM_HEADS, SEQ, SEQ), 2)
    scores = jnp.where(row >= col, scores, -1e30)
    scores = scores - jnp.max(scores, axis=-1, keepdims=True)
    p = jnp.exp(scores)
    inv = pl.reciprocal(jnp.sum(p, axis=-1, keepdims=True), approx=True)
    p = p * inv
    ctx = jnp.einsum('hqk,hkd->hqd', p, v3, preferred_element_type=jnp.float32)
    ctx = jnp.transpose(ctx, (1, 0, 2)).reshape(SEQ, HIDDEN)
    attn_out = jnp.dot(ctx, wo_ref[0],
                       preferred_element_type=jnp.float32) + bo

    # ---- MLP branch on post_attention_layernorm(h)  (parallel residual) ----
    y = _layernorm(h, ln2w, ln2b)
    y = jnp.dot(y, w1_ref[0], preferred_element_type=jnp.float32) + b1
    # TODO(synk): torch nn.GELU is exact erf-GELU; tanh approximation used here.
    y = jax.nn.gelu(y, approximate=True)
    mlp_out = jnp.dot(y, w2_ref[0], preferred_element_type=jnp.float32) + b2

    h_new = mlp_out + attn_out + h
    h_scratch[...] = h_new

    @pl.when(l == NUM_LAYERS - 1)
    def _():
        out_ref[...] = _layernorm(h_new, finw, finb)   # fused final_layer_norm


# ---------------- glue: rope tables, packed small params, model params ----------------
def build_rope_tables(position_ids):
    inv_freq = 1.0 / (ROPE_THETA ** (
        jnp.arange(0, ROTARY_DIM, 2, dtype=jnp.float32) / ROTARY_DIM))      # [HALF_ROT]
    freqs = position_ids.astype(jnp.float32)[:, None] * inv_freq[None, :]   # [S, HALF_ROT]
    cos_r, sin_r = jnp.cos(freqs), jnp.sin(freqs)
    ones_pass = jnp.ones((SEQ, HEAD_SIZE - ROTARY_DIM), jnp.float32)
    zeros_pass = jnp.zeros((SEQ, HEAD_SIZE - ROTARY_DIM), jnp.float32)
    zeros_half = jnp.zeros((SEQ, HALF_ROT), jnp.float32)
    cos_head = jnp.concatenate([cos_r, cos_r, ones_pass], axis=-1)          # [S, HEAD_SIZE]
    sin_lo_head = jnp.concatenate([-sin_r, zeros_half, zeros_pass], axis=-1)
    sin_hi_head = jnp.concatenate([zeros_half, sin_r, zeros_pass], axis=-1)
    cos = jnp.tile(cos_head, (1, NUM_HEADS))                                # [S, H]
    sin_lo = jnp.tile(sin_lo_head, (1, NUM_HEADS))
    sin_hi = jnp.tile(sin_hi_head, (1, NUM_HEADS))
    return jnp.stack([cos, sin_lo, sin_hi], axis=0)                         # [3, S, H]


def _pad_row(v):
    v = v.reshape(1, -1).astype(jnp.float32)
    return jnp.pad(v, ((0, 0), (0, PACK_W - v.shape[1])))


def pack_small_params(params):
    blocks = []
    for l in range(NUM_LAYERS):
        rows = [
            _pad_row(params["ln1w"][l]), _pad_row(params["ln1b"][l]),
            _pad_row(params["ln2w"][l]), _pad_row(params["ln2b"][l]),
            _pad_row(params["bqkv"][l]), _pad_row(params["bo"][l]),
            _pad_row(params["b1"][l]),   _pad_row(params["b2"][l]),
            _pad_row(params["final_ln_w"]), _pad_row(params["final_ln_b"]),
        ]
        blocks.append(jnp.concatenate(rows, axis=0))
    return jnp.stack(blocks, axis=0)                     # [L, PACK_ROWS, PACK_W]


def init_params(key):
    def w(k, shape, s=0.02):
        return s * jax.random.normal(k, shape, jnp.float32)

    ks = jax.random.split(key, 14)
    params = {
        "embed": w(ks[0], (VOCAB, HIDDEN)),
        "ln1w": 1.0 + w(ks[1], (NUM_LAYERS, HIDDEN), 0.1),
        "ln1b": w(ks[2], (NUM_LAYERS, HIDDEN)),
        "ln2w": 1.0 + w(ks[3], (NUM_LAYERS, HIDDEN), 0.1),
        "ln2b": w(ks[4], (NUM_LAYERS, HIDDEN)),
        "wqkv": w(ks[5], (NUM_LAYERS, HIDDEN, 3 * HIDDEN)),
        "bqkv": w(ks[6], (NUM_LAYERS, 3 * HIDDEN)),
        "wo":   w(ks[7], (NUM_LAYERS, HIDDEN, HIDDEN)),
        "bo":   w(ks[8], (NUM_LAYERS, HIDDEN)),
        "w1":   w(ks[9], (NUM_LAYERS, HIDDEN, INTERMEDIATE)),
        "b1":   w(ks[10], (NUM_LAYERS, INTERMEDIATE)),
        "w2":   w(ks[11], (NUM_LAYERS, INTERMEDIATE, HIDDEN)),
        "b2":   w(ks[12], (NUM_LAYERS, HIDDEN)),
        "final_ln_w": 1.0 + w(ks[13], (HIDDEN,), 0.1),
        "final_ln_b": jnp.zeros((HIDDEN,), jnp.float32),
    }
    return params


# ---------------- pallas_call wrapper (single launch for the whole model) ----------------
def gpt_neox_forward(input_ids, position_ids, params):
    h0 = jnp.take(params["embed"], input_ids, axis=0)    # embed_in gather (glue)  [S, H]
    rope = build_rope_tables(position_ids)               # [3, S, H]
    small = pack_small_params(params)                    # [L, PACK_ROWS, PACK_W]

    grid_spec = pltpu.PrefetchScalarGridSpec(
        num_scalar_prefetch=0,
        grid=(NUM_LAYERS,),
        in_specs=[
            pl.BlockSpec((SEQ, HIDDEN), lambda l: (0, 0)),                 # h0
            pl.BlockSpec((3, SEQ, HIDDEN), lambda l: (0, 0, 0)),           # rope tables
            pl.BlockSpec((1, PACK_ROWS, PACK_W), lambda l: (l, 0, 0)),     # packed small
            pl.BlockSpec((1, HIDDEN, 3 * HIDDEN), lambda l: (l, 0, 0)),    # wqkv
            pl.BlockSpec((1, HIDDEN, HIDDEN), lambda l: (l, 0, 0)),        # wo
            pl.BlockSpec((1, HIDDEN, INTERMEDIATE), lambda l: (l, 0, 0)),  # w1
            pl.BlockSpec((1, INTERMEDIATE, HIDDEN), lambda l: (l, 0, 0)),  # w2
        ],
        out_specs=pl.BlockSpec((SEQ, HIDDEN), lambda l: (0, 0)),
        scratch_shapes=[pltpu.VMEM((SEQ, HIDDEN), jnp.float32)],           # resident h
    )
    return pl.pallas_call(
        gpt_neox_fused_kernel,
        out_shape=jax.ShapeDtypeStruct((SEQ, HIDDEN), jnp.float32),
        grid_spec=grid_spec,
        compiler_params=pltpu.CompilerParams(
            dimension_semantics=("arbitrary",)),    # layer axis carries state
    )(h0, rope, small, params["wqkv"], params["wo"], params["w1"], params["w2"])


# ---------------- pure-JAX reference for verification ----------------
def _rope_ref(x, cos_r, sin_r):
    # Exact GPT-NeoX partial rotary (slice-based), independent of the kernel's roll trick.
    x3 = x.reshape(SEQ, NUM_HEADS, HEAD_SIZE)
    xr, xp = x3[..., :ROTARY_DIM], x3[..., ROTARY_DIM:]
    x1, x2 = xr[..., :HALF_ROT], xr[..., HALF_ROT:]
    cos2 = jnp.concatenate([cos_r, cos_r], -1)[:, None, :]
    sin2 = jnp.concatenate([sin_r, sin_r], -1)[:, None, :]
    xr_out = xr * cos2 + jnp.concatenate([-x2, x1], -1) * sin2
    return jnp.concatenate([xr_out, xp], -1).reshape(SEQ, HIDDEN)


def reference_forward(input_ids, position_ids, params):
    def ln(x, w_, b_):
        mu = jnp.mean(x, -1, keepdims=True)
        xc = x - mu
        var = jnp.mean(xc * xc, -1, keepdims=True)
        return xc * jax.lax.rsqrt(var + LN_EPS) * w_ + b_

    inv_freq = 1.0 / (ROPE_THETA ** (
        jnp.arange(0, ROTARY_DIM, 2, dtype=jnp.float32) / ROTARY_DIM))
    freqs = position_ids.astype(jnp.float32)[:, None] * inv_freq[None, :]
    cos_r, sin_r = jnp.cos(freqs), jnp.sin(freqs)

    h = jnp.take(params["embed"], input_ids, axis=0)
    for l in range(NUM_LAYERS):
        x = ln(h, params["ln1w"][l], params["ln1b"][l])
        qkv = x @ params["wqkv"][l] + params["bqkv"][l]
        q, k, v = jnp.split(qkv, 3, axis=-1)
        q = _rope_ref(q, cos_r, sin_r)
        k = _rope_ref(k, cos_r, sin_r)
        q3 = jnp.transpose(q.reshape(SEQ, NUM_HEADS, HEAD_SIZE), (1, 0, 2))
        k3 = jnp.transpose(k.reshape(SEQ, NUM_HEADS, HEAD_SIZE), (1, 0, 2))
        v3 = jnp.transpose(v.reshape(SEQ, NUM_HEADS, HEAD_SIZE), (1, 0, 2))
        s = jnp.einsum('hqd,hkd->hqk', q3, k3) * (HEAD_SIZE ** -0.5)
        mask = jnp.tril(jnp.ones((SEQ, SEQ), bool))
        s = jnp.where(mask[None], s, -1e30)
        p = jax.nn.softmax(s, axis=-1)
        ctx = jnp.einsum('hqk,hkd->hqd', p, v3)
        ctx = jnp.transpose(ctx, (1, 0, 2)).reshape(SEQ, HIDDEN)
        attn_out = ctx @ params["wo"][l] + params["bo"][l]
        y = ln(h, params["ln2w"][l], params["ln2b"][l])
        mlp_out = jax.nn.gelu(y @ params["w1"][l] + params["b1"][l],
                              approximate=True) @ params["w2"][l] + params["b2"][l]
        h = mlp_out + attn_out + h
    return ln(h, params["final_ln_w"], params["final_ln_b"])


if __name__ == "__main__":
    key = jax.random.PRNGKey(0)
    k_param, k_ids = jax.random.split(key)

    params = init_params(k_param)
    input_ids = jax.random.randint(k_ids, (SEQ,), 0, VOCAB, dtype=jnp.int32)
    position_ids = jnp.arange(SEQ, dtype=jnp.int32)

    out = jax.block_until_ready(gpt_neox_forward(input_ids, position_ids, params))
    ref = jax.block_until_ready(reference_forward(input_ids, position_ids, params))

    assert out.shape == (SEQ, HIDDEN) and out.dtype == jnp.float32
    assert bool(jnp.all(jnp.isfinite(out)))
    np.testing.assert_allclose(np.asarray(out), np.asarray(ref),
                               rtol=1e-2, atol=1e-2)
    print("KERNEL_OK")
</pallas_src>

<mosaic_0001>
module attributes {stable_mosaic.version = 11 : i64} {
  func.func @gpt_neox_fused_kernel(%arg0: i32, %arg1: memref<8x128xf32, #tpu.memory_space<vmem>>, %arg2: memref<3x8x128xf32, #tpu.memory_space<vmem>>, %arg3: memref<1x10x512xf32, #tpu.memory_space<vmem>>, %arg4: memref<1x128x384xf32, #tpu.memory_space<vmem>>, %arg5: memref<1x128x128xf32, #tpu.memory_space<vmem>>, %arg6: memref<1x128x512xf32, #tpu.memory_space<vmem>>, %arg7: memref<1x512x128xf32, #tpu.memory_space<vmem>>, %arg8: memref<8x128xf32, #tpu.memory_space<vmem>>, %arg9: memref<8x128xf32, #tpu.memory_space<vmem>>) attributes {dimension_semantics = [#tpu.dimension_semantics<arbitrary>], iteration_bounds = array<i64: 2>, scalar_prefetch = 0 : i64, scratch_operands = 1 : i64, tpu.core_type = #tpu.core_type<tc>, window_params = [{pipeline_mode = #tpu.pipeline_mode<synchronous>, transform_indices = @transform_0, window_bounds = array<i64: 8, 128>}, {pipeline_mode = #tpu.pipeline_mode<synchronous>, transform_indices = @transform_1, window_bounds = array<i64: 3, 8, 128>}, {transform_indices = @transform_2, window_bounds = array<i64: 1, 10, 512>}, {transform_indices = @transform_3, window_bounds = array<i64: 1, 128, 384>}, {transform_indices = @transform_4, window_bounds = array<i64: 1, 128, 128>}, {transform_indices = @transform_5, window_bounds = array<i64: 1, 128, 512>}, {transform_indices = @transform_6, window_bounds = array<i64: 1, 512, 128>}, {pipeline_mode = #tpu.pipeline_mode<synchronous>, transform_indices = @transform_7, window_bounds = array<i64: 8, 128>}]} {
    %c0_i32 = arith.constant 0 : i32
    %0 = arith.cmpi eq, %arg0, %c0_i32 : i32
    %1 = arith.extui %0 : i1 to i32
    %c0_i32_0 = arith.constant 0 : i32
    %2 = arith.cmpi ne, %1, %c0_i32_0 : i32
    scf.if %2 {
      %c0_52 = arith.constant 0 : index
      %c0_53 = arith.constant 0 : index
      %145 = vector.load %arg1[%c0_52, %c0_53] : memref<8x128xf32, #tpu.memory_space<vmem>>, vector<8x128xf32>
      %c0_54 = arith.constant 0 : index
      %c0_55 = arith.constant 0 : index
      %146 = vector.load %arg9[%c0_54, %c0_55] : memref<8x128xf32, #tpu.memory_space<vmem>>, vector<8x128xf32>
      tpu.vector_store %arg9[%c0_54, %c0_55], %145 {strides = array<i32>} : memref<8x128xf32, #tpu.memory_space<vmem>>, vector<8x128xf32>,
    } else {
    }
    %c0 = arith.constant 0 : index
    %c0_1 = arith.constant 0 : index
    %3 = vector.load %arg9[%c0, %c0_1] : memref<8x128xf32, #tpu.memory_space<vmem>>, vector<8x128xf32>
    %c0_2 = arith.constant 0 : index
    %c0_3 = arith.constant 0 : index
    %c0_4 = arith.constant 0 : index
    %4 = vector.load %arg3[%c0_2, %c0_3, %c0_4] : memref<1x10x512xf32, #tpu.memory_space<vmem>>, vector<1x10x512xf32>
    %5 = vector.shape_cast %4 : vector<1x10x512xf32> to vector<10x512xf32>
    %6 = vector.extract_strided_slice %5 {offsets = [0, 0], sizes = [1, 128], strides = [1, 1]} : vector<10x512xf32> to vector<1x128xf32>
    %7 = vector.extract_strided_slice %5 {offsets = [1, 0], sizes = [1, 128], strides = [1, 1]} : vector<10x512xf32> to vector<1x128xf32>
    %8 = vector.extract_strided_slice %5 {offsets = [2, 0], sizes = [1, 128], strides = [1, 1]} : vector<10x512xf32> to vector<1x128xf32>
    %9 = vector.extract_strided_slice %5 {offsets = [3, 0], sizes = [1, 128], strides = [1, 1]} : vector<10x512xf32> to vector<1x128xf32>
    %10 = vector.extract_strided_slice %5 {offsets = [4, 0], sizes = [1, 384], strides = [1, 1]} : vector<10x512xf32> to vector<1x384xf32>
    %11 = vector.extract_strided_slice %5 {offsets = [5, 0], sizes = [1, 128], strides = [1, 1]} : vector<10x512xf32> to vector<1x128xf32>
    %12 = vector.extract_strided_slice %5 {offsets = [6, 0], sizes = [1, 512], strides = [1, 1]} : vector<10x512xf32> to vector<1x512xf32>
    %13 = vector.extract_strided_slice %5 {offsets = [7, 0], sizes = [1, 128], strides = [1, 1]} : vector<10x512xf32> to vector<1x128xf32>
    %14 = vector.extract_strided_slice %5 {offsets = [8, 0], sizes = [1, 128], strides = [1, 1]} : vector<10x512xf32> to vector<1x128xf32>
    %15 = vector.extract_strided_slice %5 {offsets = [9, 0], sizes = [1, 128], strides = [1, 1]} : vector<10x512xf32> to vector<1x128xf32>
    %c0_5 = arith.constant 0 : index
    %c0_6 = arith.constant 0 : index
    %c0_7 = arith.constant 0 : index
    %16 = vector.load %arg2[%c0_5, %c0_6, %c0_7] : memref<3x8x128xf32, #tpu.memory_space<vmem>>, vector<1x8x128xf32>
    %17 = vector.shape_cast %16 : vector<1x8x128xf32> to vector<8x128xf32>
    %c1 = arith.constant 1 : index
    %c0_8 = arith.constant 0 : index
    %c0_9 = arith.constant 0 : index
    %18 = vector.load %arg2[%c1, %c0_8, %c0_9] : memref<3x8x128xf32, #tpu.memory_space<vmem>>, vector<1x8x128xf32>
    %19 = vector.shape_cast %18 : vector<1x8x128xf32> to vector<8x128xf32>
    %c2 = arith.constant 2 : index
    %c0_10 = arith.constant 0 : index
    %c0_11 = arith.constant 0 : index
    %20 = vector.load %arg2[%c2, %c0_10, %c0_11] : memref<3x8x128xf32, #tpu.memory_space<vmem>>, vector<1x8x128xf32>
    %21 = vector.shape_cast %20 : vector<1x8x128xf32> to vector<8x128xf32>
    %cst = arith.constant dense<0.000000e+00> : vector<8xf32>
    %22 = vector.multi_reduction <add>, %3, %cst [1] : vector<8x128xf32> to vector<8xf32>
    %23 = vector.shape_cast %22 : vector<8xf32> to vector<8x1xf32>
    %cst_12 = arith.constant 1.280000e+02 : f32
    %24 = vector.broadcast %cst_12 : f32 to vector<8x1xf32>
    %25 = arith.divf %23, %24 : vector<8x1xf32>
    %26 = vector.broadcast %25 : vector<8x1xf32> to vector<8x128xf32>
    %27 = arith.subf %3, %26 : vector<8x128xf32>
    %28 = arith.mulf %27, %27 : vector<8x128xf32>
    %cst_13 = arith.constant dense<0.000000e+00> : vector<8xf32>
    %29 = vector.multi_reduction <add>, %28, %cst_13 [1] : vector<8x128xf32> to vector<8xf32>
    %30 = vector.shape_cast %29 : vector<8xf32> to vector<8x1xf32>
    %cst_14 = arith.constant 1.280000e+02 : f32
    %31 = vector.broadcast %cst_14 : f32 to vector<8x1xf32>
    %32 = arith.divf %30, %31 : vector<8x1xf32>
    %cst_15 = arith.constant 9.99999974E-6 : f32
    %33 = vector.broadcast %cst_15 : f32 to vector<8x1xf32>
    %34 = arith.addf %32, %33 : vector<8x1xf32>
    %35 = math.rsqrt %34 : vector<8x1xf32>
    %36 = vector.broadcast %35 : vector<8x1xf32> to vector<8x128xf32>
    %37 = arith.mulf %27, %36 : vector<8x128xf32>
    %38 = vector.broadcast %6 : vector<1x128xf32> to vector<8x128xf32>
    %39 = arith.mulf %37, %38 : vector<8x128xf32>
    %40 = vector.broadcast %7 : vector<1x128xf32> to vector<8x128xf32>
    %41 = arith.addf %39, %40 : vector<8x128xf32>
    %c0_16 = arith.constant 0 : index
    %c0_17 = arith.constant 0 : index
    %c0_18 = arith.constant 0 : index
    %42 = vector.load %arg4[%c0_16, %c0_17, %c0_18] : memref<1x128x384xf32, #tpu.memory_space<vmem>>, vector<1x128x384xf32>
    %43 = vector.shape_cast %42 : vector<1x128x384xf32> to vector<128x384xf32>
    %cst_19 = arith.constant dense<0.000000e+00> : vector<8x384xf32>
    %44 = tpu.matmul %41, %43, %cst_19 {dimension_numbers = #tpu.dot_dimension_numbers<[1], [0], [0], [1], [0, 0, 1, 1], [], []>} : vector<8x128xf32>, vector<128x384xf32>, vector<8x384xf32> -> vector<8x384xf32>
    %45 = vector.broadcast %10 : vector<1x384xf32> to vector<8x384xf32>
    %46 = arith.addf %44, %45 : vector<8x384xf32>
    %47 = vector.extract_strided_slice %46 {offsets = [0, 0], sizes = [8, 128], strides = [1, 1]} : vector<8x384xf32> to vector<8x128xf32>
    %48 = vector.extract_strided_slice %46 {offsets = [0, 128], sizes = [8, 128], strides = [1, 1]} : vector<8x384xf32> to vector<8x128xf32>
    %49 = vector.extract_strided_slice %46 {offsets = [0, 256], sizes = [8, 128], strides = [1, 1]} : vector<8x384xf32> to vector<8x128xf32>
    %c124_i32 = arith.constant 124 : i32
    %50 = tpu.dynamic_rotate %47 by %c124_i32 dim 1 : vector<8x128xf32>, i32 -> vector<8x128xf32>
    %c4_i32 = arith.constant 4 : i32
    %51 = tpu.dynamic_rotate %47 by %c4_i32 dim 1 : vector<8x128xf32>, i32 -> vector<8x128xf32>
    %52 = arith.mulf %47, %17 : vector<8x128xf32>
    %53 = arith.mulf %50, %19 : vector<8x128xf32>
    %54 = arith.addf %52, %53 : vector<8x128xf32>
    %55 = arith.mulf %51, %21 : vector<8x128xf32>
    %56 = arith.addf %54, %55 : vector<8x128xf32>
    %c124_i32_20 = arith.constant 124 : i32
    %57 = tpu.dynamic_rotate %48 by %c124_i32_20 dim 1 : vector<8x128xf32>, i32 -> vector<8x128xf32>
    %c4_i32_21 = arith.constant 4 : i32
    %58 = tpu.dynamic_rotate %48 by %c4_i32_21 dim 1 : vector<8x128xf32>, i32 -> vector<8x128xf32>
    %59 = arith.mulf %48, %17 : vector<8x128xf32>
    %60 = arith.mulf %57, %19 : vector<8x128xf32>
    %61 = arith.addf %59, %60 : vector<8x128xf32>
    %62 = arith.mulf %58, %21 : vector<8x128xf32>
    %63 = arith.addf %61, %62 : vector<8x128xf32>
    %64 = vector.shape_cast %56 : vector<8x128xf32> to vector<8x4x32xf32>
    %65 = tpu.transpose %64, [1, 0, 2] : vector<8x4x32xf32> -> vector<4x8x32xf32>
    %66 = vector.shape_cast %63 : vector<8x128xf32> to vector<8x4x32xf32>
    %67 = tpu.transpose %66, [1, 0, 2] : vector<8x4x32xf32> -> vector<4x8x32xf32>
    %68 = vector.shape_cast %49 : vector<8x128xf32> to vector<8x4x32xf32>
    %69 = tpu.transpose %68, [1, 0, 2] : vector<8x4x32xf32> -> vector<4x8x32xf32>
    "tpu.trace_start"() <{level = 10 : i32, message = "hqd,hkd->hqk"}> : () -> ()
    %cst_22 = arith.constant dense<0.000000e+00> : vector<4x8x8xf32>
    %70 = tpu.matmul %65, %67, %cst_22 {dimension_numbers = #tpu.dot_dimension_numbers<[2], [2], [1], [1], [0, 0, 0, 1, 1, 1], [0], [0]>} : vector<4x8x32xf32>, vector<4x8x32xf32>, vector<4x8x8xf32> -> vector<4x8x8xf32>
    "tpu.trace_stop"() : () -> ()
    %cst_23 = arith.constant 0.176776692 : f32
    %71 = vector.broadcast %cst_23 : f32 to vector<4x8x8xf32>
    %72 = arith.mulf %70, %71 : vector<4x8x8xf32>
    %73 = tpu.iota {dimensions = array<i32: 1>} : vector<4x8x8xi32>
    %74 = tpu.iota {dimensions = array<i32: 2>} : vector<4x8x8xi32>
    %75 = arith.cmpi sge, %73, %74 : vector<4x8x8xi32>
    %cst_24 = arith.constant -1.000000e+30 : f32
    %76 = vector.broadcast %cst_24 : f32 to vector<4x8x8xf32>
    %77 = arith.select %75, %72, %76 : vector<4x8x8xi1>, vector<4x8x8xf32>
    %cst_25 = arith.constant dense<0xFF800000> : vector<4x8xf32>
    %78 = vector.multi_reduction <maximumf>, %77, %cst_25 [2] : vector<4x8x8xf32> to vector<4x8xf32>
    %79 = vector.shape_cast %78 : vector<4x8xf32> to vector<4x8x1xf32>
    %80 = vector.broadcast %79 : vector<4x8x1xf32> to vector<4x8x8xf32>
    %81 = arith.subf %77, %80 : vector<4x8x8xf32>
    %82 = math.exp %81 : vector<4x8x8xf32>
    %cst_26 = arith.constant dense<0.000000e+00> : vector<4x8xf32>
    %83 = vector.multi_reduction <add>, %82, %cst_26 [2] : vector<4x8x8xf32> to vector<4x8xf32>
    %84 = vector.shape_cast %83 : vector<4x8xf32> to vector<4x8x1xf32>
    %85 = tpu.reciprocal %84 {approx = true} : vector<4x8x1xf32> -> vector<4x8x1xf32>
    %86 = vector.broadcast %85 : vector<4x8x1xf32> to vector<4x8x8xf32>
    %87 = arith.mulf %82, %86 : vector<4x8x8xf32>
    "tpu.trace_start"() <{level = 10 : i32, message = "hqk,hkd->hqd"}> : () -> ()
    %cst_27 = arith.constant dense<0.000000e+00> : vector<4x8x32xf32>
    %88 = tpu.matmul %87, %69, %cst_27 {dimension_numbers = #tpu.dot_dimension_numbers<[2], [1], [1], [2], [0, 0, 0, 1, 1, 2], [0], [0]>} : vector<4x8x8xf32>, vector<4x8x32xf32>, vector<4x8x32xf32> -> vector<4x8x32xf32>
    "tpu.trace_stop"() : () -> ()
    %89 = tpu.transpose %88, [1, 0, 2] : vector<4x8x32xf32> -> vector<8x4x32xf32>
    %90 = vector.shape_cast %89 : vector<8x4x32xf32> to vector<8x128xf32>
    %c0_28 = arith.constant 0 : index
    %c0_29 = arith.constant 0 : index
    %c0_30 = arith.constant 0 : index
    %91 = vector.load %arg5[%c0_28, %c0_29, %c0_30] : memref<1x128x128xf32, #tpu.memory_space<vmem>>, vector<1x128x128xf32>
    %92 = vector.shape_cast %91 : vector<1x128x128xf32> to vector<128x128xf32>
    %cst_31 = arith.constant dense<0.000000e+00> : vector<8x128xf32>
    %93 = tpu.matmul %90, %92, %cst_31 {dimension_numbers = #tpu.dot_dimension_numbers<[1], [0], [0], [1], [0, 0, 1, 1], [], []>} : vector<8x128xf32>, vector<128x128xf32>, vector<8x128xf32> -> vector<8x128xf32>
    %94 = vector.broadcast %11 : vector<1x128xf32> to vector<8x128xf32>
    %95 = arith.addf %93, %94 : vector<8x128xf32>
    %cst_32 = arith.constant dense<0.000000e+00> : vector<8xf32>
    %96 = vector.multi_reduction <add>, %3, %cst_32 [1] : vector<8x128xf32> to vector<8xf32>
    %97 = vector.shape_cast %96 : vector<8xf32> to vector<8x1xf32>
    %cst_33 = arith.constant 1.280000e+02 : f32
    %98 = vector.broadcast %cst_33 : f32 to vector<8x1xf32>
    %99 = arith.divf %97, %98 : vector<8x1xf32>
    %100 = vector.broadcast %99 : vector<8x1xf32> to vector<8x128xf32>
    %101 = arith.subf %3, %100 : vector<8x128xf32>
    %102 = arith.mulf %101, %101 : vector<8x128xf32>
    %cst_34 = arith.constant dense<0.000000e+00> : vector<8xf32>
    %103 = vector.multi_reduction <add>, %102, %cst_34 [1] : vector<8x128xf32> to vector<8xf32>
    %104 = vector.shape_cast %103 : vector<8xf32> to vector<8x1xf32>
    %cst_35 = arith.constant 1.280000e+02 : f32
    %105 = vector.broadcast %cst_35 : f32 to vector<8x1xf32>
    %106 = arith.divf %104, %105 : vector<8x1xf32>
    %cst_36 = arith.constant 9.99999974E-6 : f32
    %107 = vector.broadcast %cst_36 : f32 to vector<8x1xf32>
    %108 = arith.addf %106, %107 : vector<8x1xf32>
    %109 = math.rsqrt %108 : vector<8x1xf32>
    %110 = vector.broadcast %109 : vector<8x1xf32> to vector<8x128xf32>
    %111 = arith.mulf %101, %110 : vector<8x128xf32>
    %112 = vector.broadcast %8 : vector<1x128xf32> to vector<8x128xf32>
    %113 = arith.mulf %111, %112 : vector<8x128xf32>
    %114 = vector.broadcast %9 : vector<1x128xf32> to vector<8x128xf32>
    %115 = arith.addf %113, %114 : vector<8x128xf32>
    %c0_37 = arith.constant 0 : index
    %c0_38 = arith.constant 0 : index
    %c0_39 = arith.constant 0 : index
    %116 = vector.load %arg6[%c0_37, %c0_38, %c0_39] : memref<1x128x512xf32, #tpu.memory_space<vmem>>, vector<1x128x512xf32>
    %117 = vector.shape_cast %116 : vector<1x128x512xf32> to vector<128x512xf32>
    %cst_40 = arith.constant dense<0.000000e+00> : vector<8x512xf32>
    %118 = tpu.matmul %115, %117, %cst_40 {dimension_numbers = #tpu.dot_dimension_numbers<[1], [0], [0], [1], [0, 0, 1, 1], [], []>} : vector<8x128xf32>, vector<128x512xf32>, vector<8x512xf32> -> vector<8x512xf32>
    %119 = vector.broadcast %12 : vector<1x512xf32> to vector<8x512xf32>
    %120 = arith.addf %118, %119 : vector<8x512xf32>
    %121 = arith.mulf %120, %120 : vector<8x512xf32>
    %122 = arith.mulf %120, %121 : vector<8x512xf32>
    %cst_41 = arith.constant 4.471500e-02 : f32
    %123 = vector.broadcast %cst_41 : f32 to vector<8x512xf32>
    %124 = arith.mulf %123, %122 : vector<8x512xf32>
    %125 = arith.addf %120, %124 : vector<8x512xf32>
    %cst_42 = arith.constant 0.797884583 : f32
    %126 = vector.broadcast %cst_42 : f32 to vector<8x512xf32>
    %127 = arith.mulf %126, %125 : vector<8x512xf32>
    %128 = math.tanh %127 : vector<8x512xf32>
    %cst_43 = arith.constant 1.000000e+00 : f32
    %129 = vector.broadcast %cst_43 : f32 to vector<8x512xf32>
    %130 = arith.addf %129, %128 : vector<8x512xf32>
    %cst_44 = arith.constant 5.000000e-01 : f32
    %131 = vector.broadcast %cst_44 : f32 to vector<8x512xf32>
    %132 = arith.mulf %131, %130 : vector<8x512xf32>
    %133 = arith.mulf %120, %132 : vector<8x512xf32>
    %c0_45 = arith.constant 0 : index
    %c0_46 = arith.constant 0 : index
    %c0_47 = arith.constant 0 : index
    %134 = vector.load %arg7[%c0_45, %c0_46, %c0_47] : memref<1x512x128xf32, #tpu.memory_space<vmem>>, vector<1x512x128xf32>
    %135 = vector.shape_cast %134 : vector<1x512x128xf32> to vector<512x128xf32>
    %cst_48 = arith.constant dense<0.000000e+00> : vector<8x128xf32>
    %136 = tpu.matmul %133, %135, %cst_48 {dimension_numbers = #tpu.dot_dimension_numbers<[1], [0], [0], [1], [0, 0, 1, 1], [], []>} : vector<8x512xf32>, vector<512x128xf32>, vector<8x128xf32> -> vector<8x128xf32>
    %137 = vector.broadcast %13 : vector<1x128xf32> to vector<8x128xf32>
    %138 = arith.addf %136, %137 : vector<8x128xf32>
    %139 = arith.addf %138, %95 : vector<8x128xf32>
    %140 = arith.addf %139, %3 : vector<8x128xf32>
    %c0_49 = arith.constant 0 : index
    %c0_50 = arith.constant 0 : index
    %141 = vector.load %arg9[%c0_49, %c0_50] : memref<8x128xf32, #tpu.memory_space<vmem>>, vector<8x128xf32>
    tpu.vector_store %arg9[%c0_49, %c0_50], %140 {strides = array<i32>} : memref<8x128xf32, #tpu.memory_space<vmem>>, vector<8x128xf32>,
    %c1_i32 = arith.constant 1 : i32
    %142 = arith.cmpi eq, %arg0, %c1_i32 : i32
    %143 = arith.extui %142 : i1 to i32
    %c0_i32_51 = arith.constant 0 : i32
    %144 = arith.cmpi ne, %143, %c0_i32_51 : i32
    scf.if %144 {
      %cst_52 = arith.constant dense<0.000000e+00> : vector<8xf32>
      %145 = vector.multi_reduction <add>, %140, %cst_52 [1] : vector<8x128xf32> to vector<8xf32>
      %146 = vector.shape_cast %145 : vector<8xf32> to vector<8x1xf32>
      %cst_53 = arith.constant 1.280000e+02 : f32
      %147 = vector.broadcast %cst_53 : f32 to vector<8x1xf32>
      %148 = arith.divf %146, %147 : vector<8x1xf32>
      %149 = vector.broadcast %148 : vector<8x1xf32> to vector<8x128xf32>
      %150 = arith.subf %140, %149 : vector<8x128xf32>
      %151 = arith.mulf %150, %150 : vector<8x128xf32>
      %cst_54 = arith.constant dense<0.000000e+00> : vector<8xf32>
      %152 = vector.multi_reduction <add>, %151, %cst_54 [1] : vector<8x128xf32> to vector<8xf32>
      %153 = vector.shape_cast %152 : vector<8xf32> to vector<8x1xf32>
      %cst_55 = arith.constant 1.280000e+02 : f32
      %154 = vector.broadcast %cst_55 : f32 to vector<8x1xf32>
      %155 = arith.divf %153, %154 : vector<8x1xf32>
      %cst_56 = arith.constant 9.99999974E-6 : f32
      %156 = vector.broadcast %cst_56 : f32 to vector<8x1xf32>
      %157 = arith.addf %155, %156 : vector<8x1xf32>
      %158 = math.rsqrt %157 : vector<8x1xf32>
      %159 = vector.broadcast %158 : vector<8x1xf32> to vector<8x128xf32>
      %160 = arith.mulf %150, %159 : vector<8x128xf32>
      %161 = vector.broadcast %14 : vector<1x128xf32> to vector<8x128xf32>
      %162 = arith.mulf %160, %161 : vector<8x128xf32>
      %163 = vector.broadcast %15 : vector<1x128xf32> to vector<8x128xf32>
      %164 = arith.addf %162, %163 : vector<8x128xf32>
      %c0_57 = arith.constant 0 : index
      %c0_58 = arith.constant 0 : index
      %165 = vector.load %arg8[%c0_57, %c0_58] : memref<8x128xf32, #tpu.memory_space<vmem>>, vector<8x128xf32>
      tpu.vector_store %arg8[%c0_57, %c0_58], %164 {strides = array<i32>} : memref<8x128xf32, #tpu.memory_space<vmem>>, vector<8x128xf32>,
    } else {
    }
    return
  }
  func.func @transform_0(%arg0: i32) -> (i32, i32) {
    %c0_i32 = arith.constant 0 : i32
    %c0_i32_0 = arith.constant 0 : i32
    %c0_i32_1 = arith.constant 0 : i32
    return %c0_i32, %c0_i32_0 : i32, i32
  }
  func.func @transform_1(%arg0: i32) -> (i32, i32, i32) {
    %c0_i32 = arith.constant 0 : i32
    %c0_i32_0 = arith.constant 0 : i32
    %c0_i32_1 = arith.constant 0 : i32
    %c0_i32_2 = arith.constant 0 : i32
    return %c0_i32, %c0_i32_0, %c0_i32_1 : i32, i32, i32
  }
  func.func @transform_2(%arg0: i32) -> (i32, i32, i32) {
    %c0_i32 = arith.constant 0 : i32
    %c0_i32_0 = arith.constant 0 : i32
    %c0_i32_1 = arith.constant 0 : i32
    return %arg0, %c0_i32, %c0_i32_0 : i32, i32, i32
  }
  func.func @transform_3(%arg0: i32) -> (i32, i32, i32) {
    %c0_i32 = arith.constant 0 : i32
    %c0_i32_0 = arith.constant 0 : i32
    %c0_i32_1 = arith.constant 0 : i32
    return %arg0, %c0_i32, %c0_i32_0 : i32, i32, i32
  }
  func.func @transform_4(%arg0: i32) -> (i32, i32, i32) {
    %c0_i32 = arith.constant 0 : i32
    %c0_i32_0 = arith.constant 0 : i32
    %c0_i32_1 = arith.constant 0 : i32
    return %arg0, %c0_i32, %c0_i32_0 : i32, i32, i32
  }
  func.func @transform_5(%arg0: i32) -> (i32, i32, i32) {
    %c0_i32 = arith.constant 0 : i32
    %c0_i32_0 = arith.constant 0 : i32
    %c0_i32_1 = arith.constant 0 : i32
    return %arg0, %c0_i32, %c0_i32_0 : i32, i32, i32
  }
  func.func @transform_6(%arg0: i32) -> (i32, i32, i32) {
    %c0_i32 = arith.constant 0 : i32
    %c0_i32_0 = arith.constant 0 : i32
    %c0_i32_1 = arith.constant 0 : i32
    return %arg0, %c0_i32, %c0_i32_0 : i32, i32, i32
  }
  func.func @transform_7(%arg0: i32) -> (i32, i32) {
    %c0_i32 = arith.constant 0 : i32
    %c0_i32_0 = arith.constant 0 : i32
    %c0_i32_1 = arith.constant 0 : i32
    return %c0_i32, %c0_i32_0 : i32, i32
  }
}

</mosaic_0001>

<bundles_post_ra>
// kernel: tpu_custom_call.1
= control target key start
LH: loop header
LB: loop body
LE: loop exit
PB: predicated region body
PF: predicated region fallthrough
CT: control target
= control target key end

     0   :  { %s4233_s0 = inlined_call_operand.vmem [shape: f32[8,128], index: 0, kind: input, shape index: {}]   ;;  %s4234_s1 = inlined_call_operand.vmem [shape: f32[3,8,128], index: 1, kind: input, shape index: {}]   ;;  %s4235_s2 = inlined_call_operand.vmem [shape: f32[2,10,512], index: 2, kind: input, shape index: {}]   ;;  %s4236_s3 = inlined_call_operand.hbm [shape: f32[2,128,384], index: 3, kind: input, shape index: {}]   ;;  %s4237_s4 = inlined_call_operand.hbm [shape: f32[2,128,128], index: 4, kind: input, shape index: {}]   ;;  %s4238_s5 = inlined_call_operand.hbm [shape: f32[2,128,512], index: 5, kind: input, shape index: {}]   ;;  %s4239_s6 = inlined_call_operand.hbm [shape: f32[2,512,128], index: 6, kind: input, shape index: {}]   ;;  %s4240_s7 = inlined_call_operand.hbm [shape: f32[8,128], index: 7, kind: output, shape index: {}]  }
   0x1   :  { %4244 = sst [smem:[#allocation16_spill]] %s4236_s3 }
   0x2   :  { %4245 = sst [smem:[#allocation17_spill]] %s4237_s4 }
   0x3   :  { %12 = vsyncpa [#allocation4], 0 }
   0x4   :  { %14 = vsyncpa [#allocation4 + $0x1], 0 }
   0x5   :  { %15 = vsyncpa [#allocation7], 0 }
   0x6   :  { %17 = vsyncpa [#allocation7 + $0x1], 0 }
   0x7   :  { %18 = vsyncpa [#allocation10], 0 }
   0x8   :  { %20 = vsyncpa [#allocation10 + $0x1], 0 }
   0x9   :  { %21 = vsyncpa [#allocation5], 0  ;;  %s3510_s24 = smov 0   ;;  %s3512_s25 = smov 0  }
   0xa   :  { %s3514_s26 = smov 0   ;;  %s3516_s27 = smov 0  }
   0xb LB: > { %s3529_s28 = sadd.s32 4294967295, %s3447_s27   ;;  %s3532_s29 = sadd.s32 1, %s3447_s27   ;;  %s3447_s27 = sphi %s3516_s27, %s4259_s27   ;;  %s3443_s26 = sphi %s3514_s26, %s4258_s26   ;;  %s3439_s25 = sphi %s3512_s25, %s4257_s25   ;;  %s3435_s24 = sphi %s3510_s24, %s4256_s24  }
   0xc   : > { %s99_s30 = ssub.s32 %s3447_s27, %s3532_s29  ;;  %s102_s8 = sadd.s32 1, %s3443_s26 }
   0xd   : > { %p100_p0 = scmp.eq.s32.totalorder %s99_s30, 0  ;;  %p109_p1 = scmp.ne.s32.totalorder %s3443_s26, %s3439_s25 }
   0xe   : > { %p110_p2 = scmp.eq.s32.totalorder %s3447_s27, 0  ;;  %p115_p3 = scmp.ne.s32.totalorder %s3439_s25, %s3435_s24 }
   0xf   : > { %s3542_s9 = scalar_select %p100_p0, %s3443_s26, %s102_s8  }
  0x10   : > { %p111_p4 = por %p110_p2, %p109_p1  ;;  %p116_p5 = scmp.eq.s32.totalorder %s3529_s28, 0 }
  0x11   : > { %p3173_p6 = scmp.lt.s32.totalorder %s3447_s27, 2  ;;  %s3551_s11 = sand.u32 1, %s3443_s26  }
  0x12   : > { %p3546_p7 = por %p116_p5, %p115_p3  ;;  %s273_s13 = sand.u32 1, %s3447_s27  }
  0x13   : > { %p3553_p8 = pnand %p3173_p6, %p111_p4  ;;  %s2660_s14 = sshll.u32 %s3551_s11, 7 }
  0x14   : > { %s4246_s10 = scalar_select %p3546_p7, 1, 0 }
  0x15   : > { %s2703_s15 = sshll.u32 %s3447_s27, 11  ;;  %s277_s16 = scalar_lea.vmem [#allocation6], %s2660_s14 }
  0x16   : > { %s284_s17 = sshll.u32 %s277_s16, 4  ;;  %s4248_s4 = sld [smem:[#allocation17_spill]]  ;;  %s3565_s17 = int_to_ptr.vmem [resolvable:$true] %s284_s17 }
  0x17   : > { %s3567_s21 = scalar_lea.sflag [#allocation7], %s273_s13  ;;  %p3573_p10 = pneg %p3553_p8 }
  0x1c   : > { %s3563_s20 = scalar_lea.hbm %s4248_s4, %s2703_s15  ;;  %s3260_s8 = scalar_lea.hbm %s4248_s4, 4096 }
  0x1d   : > { %s3255_s22 = scalar_lea.hbm %s3563_s20, 2048  ;;  %p3261_p13 = scmp.lt.u32.totalorder %s3563_s20, %s4248_s4 }
  0x1e   : > { %p3256_p9 = scmp.ne.s32.totalorder %s3563_s20, %s3255_s22  ;;  %p3262_p0 = scmp.lt.u32.totalorder %s3260_s8, %s3255_s22 }
  0x1f   : > { %p3264_p2 = scmp.lt.u32.totalorder %s3255_s22, %s3563_s20 }
  0x20   : > { %p3258_p11 = pnand %p3573_p10, %p3256_p9  ;;  %p3263_p1 = por %p3262_p0, %p3261_p13 }
  0x22   : > { %p3259_p12 = pneg %p3258_p11  ;;  %p3265_p3 = por %p3264_p2, %p3263_p1 }
  0x24   : > { %p3266_p4 = pnand %p3265_p3, %p3259_p12 }
  0x26   : > { %3269 = shalt.err (!%p3266_p4)
}
  0x27   : > { %s3270_s13 = scalar_lea.vmem %s3565_s17, 2048  ;;  %s3449_s16 = smov [#allocation6]  }
  0x28   : > { %p3271_p5 = scmp.ne.s32.totalorder %s3565_s17, %s3270_s13  ;;  %s3275_s18 = sshll.u32 %s3449_s16, 4  ;;  %s3276_s18 = int_to_ptr.vmem [resolvable:$false] %s3275_s18 }
  0x29   : > { %s3277_s19 = scalar_lea.vmem %s3276_s18, 4096  ;;  %p3278_p11 = scmp.lt.s32.totalorder %s3565_s17, %s3276_s18 }
  0x2a   : > { %p3273_p6 = pnand %p3271_p5, %p3573_p10  ;;  %p3279_p7 = scmp.lt.s32.totalorder %s3277_s19, %s3270_s13 }
  0x2c   : > { %p3274_p9 = pneg %p3273_p6  ;;  %p3280_p13 = por %p3279_p7, %p3278_p11 }
  0x2e   : > { %p3281_p0 = pnand %p3280_p13, %p3274_p9 }
  0x30   : > { %3284 = shalt.err (!%p3281_p0)
}
  0x31   : > { %s4242_s22 = smov 128   ;;  %s4243_s24 = smov 8  }
  0x32   : > { %3166 = dma.hbm_to_vmem [thread:$0]  (!%p3553_p8), %s3563_s20, 2048, %s3565_s17, %s3567_s21, %s4242_s22, %s4242_s22, %s4243_s24  }
  0x33   : > { %p2669_p7 = scmp.ge.s32.totalorder %s3447_s27, 1  ;;  %p334_p12 = scmp.lt.s32.totalorder %s3447_s27, 3 }
  0x34   : > { %s3145_s30 = smul.u32 384, %s3551_s11  ;;  %s4251_s3 = sld [smem:[#allocation16_spill]] }
  0x35   : > { %p3603_p1 = pnand %p2669_p7, %p334_p12  ;;  %s3146_s14 = smul.u32 6144, %s3447_s27 }
  0x36   : > { %s256_s18 = scalar_lea.vmem [#allocation3], %s3145_s30  ;;  %s253_s17 = scalar_lea.sflag [#allocation4], %s3551_s11 }
  0x37   : > { %s4250_s8 = scalar_select %p3603_p1, 1, 0 }
  0x38   : > { %s263_s19 = sshll.u32 %s256_s18, 4  ;;  %s3613_s19 = int_to_ptr.vmem [resolvable:$true] %s263_s19 }
  0x3a   : > { %s3611_s16 = scalar_lea.hbm %s4251_s3, %s3146_s14  ;;  %s3290_s15 = scalar_lea.hbm %s4251_s3, 12288 }
  0x3b   : > { %s3285_s20 = scalar_lea.hbm %s3611_s16, 6144  ;;  %p3291_p5 = scmp.lt.u32.totalorder %s3611_s16, %s4251_s3 }
  0x3c   : > { %p3286_p2 = scmp.ne.s32.totalorder %s3611_s16, %s3285_s20  ;;  %p3292_p6 = scmp.lt.u32.totalorder %s3290_s15, %s3285_s20 }
  0x3d   : > { %p3294_p11 = scmp.lt.u32.totalorder %s3285_s20, %s3611_s16 }
  0x3e   : > { %p3288_p3 = pnand %p3286_p2, %p3573_p10  ;;  %p3293_p9 = por %p3292_p6, %p3291_p5 }
  0x40   : > { %p3289_p4 = pneg %p3288_p3  ;;  %p3295_p13 = por %p3294_p11, %p3293_p9 }
  0x42   : > { %p3296_p0 = pnand %p3295_p13, %p3289_p4 }
  0x44   : > { %3299 = shalt.err (!%p3296_p0)
}
  0x45   : > { %s3300_s30 = scalar_lea.vmem %s3613_s19, 6144  ;;  %s3452_s22 = smov [#allocation3]  }
  0x46   : > { %p3301_p7 = scmp.ne.s32.totalorder %s3613_s19, %s3300_s30  ;;  %s3305_s24 = sshll.u32 %s3452_s22, 4  ;;  %s3306_s24 = int_to_ptr.vmem [resolvable:$false] %s3305_s24 }
  0x47   : > { %s3307_s18 = scalar_lea.vmem %s3306_s24, 12288  ;;  %p3308_p3 = scmp.lt.s32.totalorder %s3613_s19, %s3306_s24 }
  0x48   : > { %p3303_p12 = pnand %p3301_p7, %p3573_p10  ;;  %p3309_p1 = scmp.lt.s32.totalorder %s3307_s18, %s3300_s30 }
  0x4a   : > { %p3304_p2 = pneg %p3303_p12  ;;  %p3310_p5 = por %p3309_p1, %p3308_p3 }
  0x4c   : > { %p3311_p6 = pnand %p3310_p5, %p3304_p2 }
  0x4e   : > { %3314 = shalt.err (!%p3311_p6)
}
  0x4f   : > { %s3453_s20 = smov 384   ;;  %s3454_s15 = smov 24  }
  0x50   : > { %3163 = dma.hbm_to_vmem [thread:$0]  (!%p3553_p8), %s3611_s16, 6144, %s3613_s19, %s253_s17, %s3453_s20, %s3453_s20, %s3454_s15  }
  0x51   : > { %s2663_s14 = sshll.u32 %s3551_s11, 9  ;;  %s2704_s13 = sshll.u32 %s3447_s27, 13 }
  0x52   : > { %s3646_s24 = scalar_lea.hbm %s4238_s5, %s2704_s13  ;;  %s298_s18 = scalar_lea.vmem [#allocation8], %s2663_s14 }
  0x53   : > { %s305_s3 = sshll.u32 %s298_s18, 4  ;;  %s3315_s4 = scalar_lea.hbm %s3646_s24, 8192  ;;  %s3650_s3 = int_to_ptr.vmem [resolvable:$true] %s305_s3 }
  0x54   : > { %p3316_p1 = scmp.ne.s32.totalorder %s3646_s24, %s3315_s4  ;;  %s3320_s17 = scalar_lea.hbm %s4238_s5, 16384 }
  0x55   : > { %p3321_p11 = scmp.lt.u32.totalorder %s3646_s24, %s4238_s5  ;;  %p3322_p13 = scmp.lt.u32.totalorder %s3320_s17, %s3315_s4 }
  0x56   : > { %p3318_p4 = pnand %p3316_p1, %p3573_p10  ;;  %p3324_p7 = scmp.lt.u32.totalorder %s3315_s4, %s3646_s24 }
  0x57   : > { %p3323_p0 = por %p3322_p13, %p3321_p11 }
  0x58   : > { %p3319_p9 = pneg %p3318_p4 }
  0x59   : > { %p3325_p12 = por %p3324_p7, %p3323_p0 }
  0x5b   : > { %p3326_p2 = pnand %p3325_p12, %p3319_p9 }
  0x5d   : > { %3329 = shalt.err (!%p3326_p2)
}
  0x5e   : > { %s3330_s30 = scalar_lea.vmem %s3650_s3, 8192  ;;  %s3455_s22 = smov [#allocation8]  }
  0x5f   : > { %p3331_p3 = scmp.ne.s32.totalorder %s3650_s3, %s3330_s30  ;;  %s3335_s18 = sshll.u32 %s3455_s22, 4  ;;  %s3336_s18 = int_to_ptr.vmem [resolvable:$false] %s3335_s18 }
  0x60   : > { %s3337_s16 = scalar_lea.vmem %s3336_s18, 16384  ;;  %p3338_p1 = scmp.lt.s32.totalorder %s3650_s3, %s3336_s18 }
  0x61   : > { %p3333_p5 = pnand %p3331_p3, %p3573_p10  ;;  %p3339_p4 = scmp.lt.s32.totalorder %s3337_s16, %s3330_s30 }
  0x63   : > { %p3334_p6 = pneg %p3333_p5  ;;  %p3340_p11 = por %p3339_p4, %p3338_p1 }
  0x65   : > { %p3341_p13 = pnand %p3340_p11, %p3334_p6 }
  0x67   : > { %3344 = shalt.err (!%p3341_p13)
}
  0x68   : > { %s3456_s4 = smov 512   ;;  %s3457_s19 = smov 32  }
  0x69   : > { %3169 = dma.hbm_to_vmem [thread:$0]  (!%p3553_p8), %s3646_s24, 8192, %s3650_s3, %s3567_s21, %s3456_s4, %s3456_s4, %s3457_s19  }
  0x6a   : > { %s3679_s15 = scalar_lea.hbm %s4239_s6, %s2704_s13  ;;  %s319_s30 = scalar_lea.vmem [#allocation9], %s2663_s14 }
  0x6b   : > { %s326_s22 = sshll.u32 %s319_s30, 4  ;;  %s316_s18 = scalar_lea.sflag [#allocation10], %s3551_s11  ;;  %s3683_s22 = int_to_ptr.vmem [resolvable:$true] %s326_s22 }
  0x6c   : > { %s3345_s16 = scalar_lea.hbm %s3679_s15, 8192  ;;  %s3350_s21 = scalar_lea.hbm %s4239_s6, 16384 }
  0x6d   : > { %p3346_p9 = scmp.ne.s32.totalorder %s3679_s15, %s3345_s16  ;;  %p3351_p12 = scmp.lt.u32.totalorder %s3679_s15, %s4239_s6 }
  0x6e   : > { %p3352_p2 = scmp.lt.u32.totalorder %s3350_s21, %s3345_s16  ;;  %p3354_p5 = scmp.lt.u32.totalorder %s3345_s16, %s3679_s15 }
  0x6f   : > { %p3348_p0 = pnand %p3346_p9, %p3573_p10 }
  0x70   : > { %p3353_p3 = por %p3352_p2, %p3351_p12 }
  0x71   : > { %p3349_p7 = pneg %p3348_p0 }
  0x72   : > { %p3355_p6 = por %p3354_p5, %p3353_p3 }
  0x74   : > { %p3356_p1 = pnand %p3355_p6, %p3349_p7 }
  0x76   : > { %3359 = shalt.err (!%p3356_p1)
}
  0x77   : > { %s3360_s14 = scalar_lea.vmem %s3683_s22, 8192  ;;  %s3458_s4 = smov [#allocation9]  }
  0x78   : > { %p3361_p4 = scmp.ne.s32.totalorder %s3683_s22, %s3360_s14  ;;  %s3365_s19 = sshll.u32 %s3458_s4, 4  ;;  %s3366_s19 = int_to_ptr.vmem [resolvable:$false] %s3365_s19 }
  0x79   : > { %s3367_s17 = scalar_lea.vmem %s3366_s19, 16384  ;;  %p3368_p9 = scmp.lt.s32.totalorder %s3683_s22, %s3366_s19 }
  0x7a   : > { %p3363_p11 = pnand %p3361_p4, %p3573_p10  ;;  %p3369_p0 = scmp.lt.s32.totalorder %s3367_s17, %s3360_s14 }
  0x7c   : > { %p3364_p13 = pneg %p3363_p11  ;;  %p3370_p12 = por %p3369_p0, %p3368_p9 }
  0x7e   : > { %p3371_p2 = pnand %p3370_p12, %p3364_p13 }
  0x80   : > { %3374 = shalt.err (!%p3371_p2)
}
  0x81   : > { %s4252_s20 = smov 8   ;;  %s4253_s30 = smov 128  }
  0x82   : > { %3172 = dma.hbm_to_vmem [thread:$0]  (!%p3553_p8), %s3679_s15, 8192, %s3683_s22, %s316_s18, %s4253_s30, %s4253_s30, %s4252_s20  }
  0x83   : > { %p4254_p10 = scmp.ne.s32.totalorder %s4250_s8, 0 }
  0x84   : > { %s340_s23 = sand.u32 (!%p4254_p10), 1, %s3439_s25   ;;  %p4255_p7 = scmp.ne.s32.totalorder (!%p4254_p10), %s4246_s10, 0 }
  0x85   : > { %338 = sbr.rel (%p4254_p10) target bundleno = 2730 (0xaaa), region = 48  ;;  %s341_s3 = scalar_lea.sflag (!%p4254_p10), [#allocation4], %s340_s23 }
  0x86   : > { %s3147_s16 = smul.u32 (!%p4254_p10), 384, %s340_s23 }
  0x88   : > { %s3715_s27 = scalar_lea.vmem (!%p4254_p10), [#allocation3], %s3147_s16 }
  0x8c   : > { %3418 = dma.done.wait (%p4255_p7), %s341_s3, 6144  }
  0x8d   : > { %3420 = vsyncadd (%p4255_p7), %s341_s3, 4294961152  ;;  %s349_s11 = sand.u32 1, %s3529_s28   ;;  %s2670_s12 = sshll.u32 %s340_s23, 7 }
  0x8e   : > { %s350_s15 = scalar_lea.sflag [#allocation7], %s349_s11  ;;  %s3722_s22 = scalar_lea.vmem [#allocation6], %s2670_s12 }
  0x8f   : > { %3422 = dma.done.wait (%p4255_p7), %s350_s15, 10240  }
  0x90   : > { %3424 = vsyncadd (%p4255_p7), %s350_s15, 4294957056  ;;  %s2671_s8 = sshll.u32 %s340_s23, 9  ;;  %s368_s21 = scalar_lea.sflag [#allocation10], %s340_s23 }
  0x91   : > { %s3728_s18 = scalar_lea.vmem [#allocation8], %s2671_s8  ;;  %s3730_s13 = scalar_lea.vmem [#allocation9], %s2671_s8 }
  0x92   : > { %3426 = dma.done.wait (%p4255_p7), %s368_s21, 8192  }
  0x93   : > { %3428 = vsyncadd (%p4255_p7), %s368_s21, 4294959104  ;;  %p417_p8 = scmp.lt.s32.totalorder %s3529_s28, 1  ;;  %p2675_p3 = scmp.ne.s32.totalorder %s3529_s28, 0 }
  0x94   : > { %v426_v0 = vld [vmem:[%s4233_s0] sm:$0xff] (!%p2675_p3) }
  0x95   : > { %s418_s24 = scalar_select %p417_p8, %s3529_s28, 1 }
  0x96   : > { %425 = sbr.rel (%p2675_p3) target bundleno = 157 (0x9d), region = 68  ;;  %427 = vst [vmem:[#allocation2] sm:$0xff] (!%p2675_p3), %v426_v0 }
  0x97   : > { %s2706_s14 = sshll.u32 %s418_s24, 6 }
  0x98   : > { %s3741_s17 = scalar_lea.vmem %s4235_s2, %s2706_s14 }
  0x9d PF: > { %v428_v1 = vld [vmem:[#allocation2] sm:$0xff]  ;;  %v462_v3 = vld [vmem:[%s3715_s27 + $0x8] sm:$0xff]  ;;  %v465_v4 = vld [vmem:[%s3715_s27 + $0x20] sm:$0xff]  ;;  %v3459_v6 = vmov 0.0|0.0   ;;  %v3460_v59 = vmov 0.0   ;;  %vm3461_vm0 = vmmov 0  }
  0x9e   : > { %439 = vadd.xlane.f32.xlu0 %v428_v1  ;;  %v3748_v2 = vld [vmem:[%s3741_s17 + $0x20] sm:$0x3]  ;;  %v2937_v5 = vpack.c.bf16 %v465_v4, %v462_v3  ;;  %2969 = vmatprep.subr.bf16.mxu1 %v3459_v6  ;;  %v461_v7 = vld [vmem:[%s3715_s27] sm:$0xff]  ;;  %v463_v9 = vld [vmem:[%s3715_s27 + $0x10] sm:$0xff]  ;;  %s3462_s10 = smov 124   ;;  %s3463_s23 = smov 4  }
  0x9f   : > { %v464_v8 = vld [vmem:[%s3715_s27 + $0x18] sm:$0xff]  ;;  %v466_v11 = vld [vmem:[%s3715_s27 + $0x28] sm:$0xff]  ;;  %v471_v13 = vld [vmem:[%s3715_s27 + $0x50] sm:$0xff]  ;;  %585 = vmatprep.mubr.f32.mxu0 %v3460_v59  ;;  %2859 = vmatprep.mubr.msk.f32.mxu1 %vm3461_vm0, %v3460_v59  ;;  %s3464_s8 = smov 32   ;;  %s3465_s21 = smov 96   ;;  %vm1118_vm1 = vcmask 261120  }
  0xa0   : > { %v2939_v10 = vpack.c.bf16 %v464_v8, %v461_v7  ;;  %v468_v12 = vld [vmem:[%s3715_s27 + $0x38] sm:$0xff]  ;;  %2938 = vmatprep.subr.bf16.mxu0 %v2937_v5  ;;  %v2970_v14 = vpack.c.bf16 %v466_v11, %v463_v9  ;;  %v467_v16 = vld [vmem:[%s3715_s27 + $0x30] sm:$0xff]  ;;  %v470_v17 = vld [vmem:[%s3715_s27 + $0x48] sm:$0xff]  ;;  %s3466_s24 = smov 64   ;;  %vm1436_vm3 = vcmask 64512   ;;  %vm1922_vm4 = vcmask 523264  }
  0xa1   : > { %v2941_v15 = vpack.c.bf16 %v471_v13, %v468_v12  ;;  %v469_v18 = vld [vmem:[%s3715_s27 + $0x40] sm:$0xff]  ;;  %v2943_v19 = vpack.c.bf16 %v470_v17, %v467_v16  ;;  %v472_v20 = vld [vmem:[%s3715_s27 + $0x58] sm:$0xff]  ;;  %v474_v21 = vld [vmem:[%s3715_s27 + $0x68] sm:$0xff]  ;;  %vm1924_vm5 = vcmask 785408   ;;  %p2698_p5 = scmp.ne.s32.totalorder %s3529_s28, 1 }
  0xa2   : > { %2940 = vmatpush1.bf16.msra.mxu0 %v2939_v10  ;;  %v477_v22 = vld [vmem:[%s3715_s27 + $0x80] sm:$0xff]  ;;  %2971 = vmatpush3.bf16.msra.mxu1 %v2970_v14  ;;  %v2973_v23 = vpack.c.bf16 %v472_v20, %v469_v18  ;;  %v476_v26 = vld [vmem:[%s3715_s27 + $0x78] sm:$0xff]  ;;  %v475_v27 = vld [vmem:[%s3715_s27 + $0x70] sm:$0xff] }
  0xa3   : > { %2942 = vmatprep.subr.bf16.mxu0 %v2941_v15  ;;  %v2945_v24 = vpack.c.bf16 %v477_v22, %v474_v21  ;;  %v473_v25 = vld [vmem:[%s3715_s27 + $0x60] sm:$0xff]  ;;  %2972 = vmatprep.subr.bf16.mxu1 %v3459_v6  ;;  %v478_v28 = vld [vmem:[%s3715_s27 + $0x88] sm:$0xff]  ;;  %v480_v35 = vld [vmem:[%s3715_s27 + $0x98] sm:$0xff]  ;;  %v451_v21 = vlaneseq }
  0xa4   : > { %v2947_v29 = vpack.c.bf16 %v476_v26, %v473_v25  ;;  %v2976_v30 = vpack.c.bf16 %v478_v28, %v475_v27  ;;  %v483_v36 = vld [vmem:[%s3715_s27 + $0xb0] sm:$0xff]  ;;  %v482_v39 = vld [vmem:[%s3715_s27 + $0xa8] sm:$0xff]  ;;  %v481_v40 = vld [vmem:[%s3715_s27 + $0xa0] sm:$0xff] }
  0xa5   : > { %v2949_v37 = vpack.c.bf16 %v483_v36, %v480_v35  ;;  %v479_v38 = vld [vmem:[%s3715_s27 + $0x90] sm:$0xff]  ;;  %v484_v42 = vld [vmem:[%s3715_s27 + $0xb8] sm:$0xff]  ;;  %v486_v44 = vld [vmem:[%s3715_s27 + $0xc8] sm:$0xff] }
  0xa6   : > { %2944 = vmatpush1.bf16.msra.mxu0 %v2943_v19  ;;  %2974 = vmatpush3.bf16.msra.mxu1 %v2973_v23  ;;  %v2951_v41 = vpack.c.bf16 %v482_v39, %v479_v38  ;;  %v2979_v43 = vpack.c.bf16 %v484_v42, %v481_v40  ;;  %v489_v45 = vld [vmem:[%s3715_s27 + $0xe0] sm:$0xff]  ;;  %v488_v48 = vld [vmem:[%s3715_s27 + $0xd8] sm:$0xff]  ;;  %v487_v49 = vld [vmem:[%s3715_s27 + $0xd0] sm:$0xff]  ;;  %v3816_v23 = vshrl.u32 %v451_v21, 7 }
  0xa7   : > { %2946 = vmatprep.subr.bf16.mxu0 %v2945_v24  ;;  %2975 = vmatprep.subr.bf16.mxu1 %v3459_v6  ;;  %v2953_v46 = vpack.c.bf16 %v489_v45, %v486_v44  ;;  %v485_v47 = vld [vmem:[%s3715_s27 + $0xc0] sm:$0xff]  ;;  %v490_v51 = vld [vmem:[%s3715_s27 + $0xe8] sm:$0xff]  ;;  %v492_v52 = vld [vmem:[%s3715_s27 + $0xf8] sm:$0xff] }
  0xa8   : > { %v2955_v50 = vpack.c.bf16 %v488_v48, %v485_v47  ;;  %v495_v53 = vld [vmem:[%s3715_s27 + $0x110] sm:$0xff]  ;;  %v2982_v54 = vpack.c.bf16 %v490_v51, %v487_v49  ;;  %v494_v57 = vld [vmem:[%s3715_s27 + $0x108] sm:$0xff]  ;;  %v493_v58 = vld [vmem:[%s3715_s27 + $0x100] sm:$0xff]  ;;  %v453_v24 = vsub.s32 0, %v3816_v23  ;;  %v458_v26 = vsub.s32 1, %v3816_v23 }
  0xa9   : > { %v2957_v55 = vpack.c.bf16 %v495_v53, %v492_v52  ;;  %v491_v56 = vld [vmem:[%s3715_s27 + $0xf0] sm:$0xff]  ;;  %v496_v61 = vld [vmem:[%s3715_s27 + $0x118] sm:$0xff]  ;;  %v498_v62 = vld [vmem:[%s3715_s27 + $0x128] sm:$0xff] }
  0xaa   : > { %2948 = vmatpush1.bf16.msra.mxu0 %v2947_v29  ;;  %2977 = vmatpush3.bf16.msra.mxu1 %v2976_v30  ;;  %v2959_v60 = vpack.c.bf16 %v494_v57, %v491_v56  ;;  %v501_v63 = vld [vmem:[%s3715_s27 + $0x140] sm:$0xff]  ;;  %v2985_v0 = vpack.c.bf16 %v496_v61, %v493_v58  ;;  %v500_v4 = vld [vmem:[%s3715_s27 + $0x138] sm:$0xff]  ;;  %v499_v5 = vld [vmem:[%s3715_s27 + $0x130] sm:$0xff] }
  0xab   : > { %2978 = vmatprep.subr.bf16.mxu1 %v3459_v6  ;;  %2950 = vmatprep.subr.bf16.mxu0 %v2949_v37  ;;  %v497_v3 = vld [vmem:[%s3715_s27 + $0x120] sm:$0xff]  ;;  %v502_v7 = vld [vmem:[%s3715_s27 + $0x148] sm:$0xff]  ;;  %v504_v8 = vld [vmem:[%s3715_s27 + $0x158] sm:$0xff] }
  0xac   : > { %v507_v9 = vld [vmem:[%s3715_s27 + $0x170] sm:$0xff]  ;;  %v2963_v10 = vpack.c.bf16 %v500_v4, %v497_v3  ;;  %v2988_v11 = vpack.c.bf16 %v502_v7, %v499_v5  ;;  %v506_v14 = vld [vmem:[%s3715_s27 + $0x168] sm:$0xff]  ;;  %v505_v15 = vld [vmem:[%s3715_s27 + $0x160] sm:$0xff] }
  0xad   : > { %v2965_v12 = vpack.c.bf16 %v507_v9, %v504_v8  ;;  %v503_v13 = vld [vmem:[%s3715_s27 + $0x150] sm:$0xff]  ;;  %v508_v16 = vld [vmem:[%s3715_s27 + $0x178] sm:$0xff]  ;;  %v2676_v44 = vld [vmem:[%s4234_s1 + $0x8] sm:$0xff] }
  0xae   : > { %2952 = vmatpush1.bf16.msra.mxu0 %v2951_v41  ;;  %2980 = vmatpush3.bf16.msra.mxu1 %v2979_v43  ;;  %v2967_v17 = vpack.c.bf16 %v506_v14, %v503_v13  ;;  %v2991_v18 = vpack.c.bf16 %v508_v16, %v505_v15  ;;  %v3820_v25 = vld [vmem:[%s3741_s17] sm:$0xff] }
  0xaf   : > { %2981 = vmatprep.subr.bf16.mxu1 %v3459_v6  ;;  %2954 = vmatprep.subr.bf16.mxu0 %v2953_v46  ;;  %v454_v27 = vrot.slane %v3820_v25, %v453_v24  ;;  %v459_v30 = vrot.slane %v3820_v25, %v458_v26  ;;  %v434_v46 = vld [vmem:[%s4234_s1] sm:$0xff] }
  0xb2   : > { %2956 = vmatpush1.bf16.msra.mxu0 %v2955_v50  ;;  %2983 = vmatpush3.bf16.msra.mxu1 %v2982_v54  ;;  %v2677_v50 = vld [vmem:[%s4234_s1 + $0x10] sm:$0xff] }
  0xb3   : > { %2958 = vmatprep.subr.bf16.mxu0 %v2957_v55  ;;  %2984 = vmatprep.subr.bf16.mxu1 %v3459_v6 }
  0xb6   : > { %2960 = vmatpush1.bf16.msra.mxu0 %v2959_v60  ;;  %2986 = vmatpush3.bf16.msra.mxu1 %v2985_v0 }
  0xb7   : > { %2987 = vmatprep.subr.bf16.mxu1 %v3459_v6 }
  0xba   : > { %2989 = vmatpush3.bf16.msra.mxu1 %v2988_v11 }
  0xbb   : > { %2990 = vmatprep.subr.bf16.mxu1 %v3459_v6 }
  0xbe   : > { %2992 = vmatpush3.bf16.msra.mxu1 %v2991_v18 }
  0xbf   : > { %2862 = vmatprep.subr.mxu1 %v3460_v59 }
 0x12b   : > { %v440_v31 = vpop.xlane.xlu0 %439 }
 0x12c   : > { %v442_v32 = vmul.f32 0.0078125, %v440_v31 }
 0x12e   : > { %v3772_v33 = vsub.f32 %v428_v1, %v442_v32  ;;  %v2961_v1 = vpack.c.bf16 %v501_v63, %v498_v62  ;;  %v3467_v63 = vmov 1983009808  }
 0x12f   : > { %v693_v0 = vunpack.c.l.s4 %v3467_v63 }
 0x130   : > { %v444_v34 = vmul.f32 %v3772_v33, %v3772_v33  ;;  %2962 = vmatprep.subr.bf16.mxu0 %v2961_v1  ;;  %v3468_v1 = vmov 1934713408  }
 0x131   : > { %2964 = vmatpush1.bf16.msra.mxu0 %v2963_v10  ;;  %v725_v3 = vunpack.c.l.s4 %v3468_v1  ;;  %v694_v5 = vunpack.c.0.s8 %v693_v0 }
 0x132   : > { %445 = vadd.xlane.f32.xlu0 %v444_v34  ;;  %2966 = vmatprep.subr.bf16.mxu0 %v2965_v12  ;;  %v3838_v34 = vsub.s32 4, %v3816_v23 }
 0x133   : > { %v726_v7 = vunpack.c.0.s8 %v725_v3  ;;  %v3865_v11 = vsub.s32 %v694_v5, %v3816_v23 }
 0x134   : > { %v512_v35 = vrot.slane %v3820_v25, %v3838_v34 }
 0x135   : > { %2968 = vmatpush1.bf16.msra.mxu0 %v2967_v17  ;;  %v3868_v15 = vsub.s32 %v726_v7, %v3816_v23 }
 0x136   : > { %2993 = vmatprep.subr.bf16.mxu0 %v3459_v6 }
 0x1bf   : > { %v446_v19 = vpop.xlane.xlu0 %445 }
 0x1c0   : > { %v447_v20 = vmul.f32 0.0078125, %v446_v19 }
 0x1c2   : > { %v448_v22 = vadd.f32 1e-05, %v447_v20 }
 0x1c4   : > { %3225 = vrsqrt.f32 %v448_v22 }
 0x1ce   : > { %v3226_v28 = vpop.eup %3225 }
 0x1cf   : > { %v3827_v29 = vmul.f32 %v3226_v28, %v3772_v33  ;;  %v3841_v33 = vld [vmem:[%s3741_s17 + $0x8] sm:$0xff] }
 0x1d0   : > { %v516_v36 = vrot.slane %v3841_v33, %v3838_v34 }
 0x1d1   : > { %v455_v31 = vmul.f32 %v454_v27, %v3827_v29 }
 0x1d3   : > { %v460_v32 = vadd.f32 %v459_v30, %v455_v31 }
 0x1d5   : > { %586 = vmatmul.mubr.f32.vlgmr.msra.gmra.mrb[0].mxu0 %v460_v32  ;;  %2860 = vmatmul.mubr.f32.vlgmr.msra.gmra.mrb[0].mxu1 %v460_v32 }
 0x1d6   : > { %2864 = vmatprep.mubr.msk.f32.mxu1 %vm3461_vm0, %v3460_v59  ;;  %2934 = vmatprep.mubr.msk.f32.mxu0 %vm3461_vm0, %v3460_v59 }
 0x2a8   : > { %v587_v37 = vpop.f32.mrb[0].mxu0  ;;  %v3847_v38 = vpop.f32.mrb[0].mxu1 }
 0x2a9   : > { %v588_v39 = vadd.f32 %v587_v37, %v512_v35  ;;  %v589_v40 = vpop.f32.mrb[1].mxu0  ;;  %v2861_v41 = vpop.f32.mrb[1].mxu1 }
 0x2aa   : > { %v590_v42 = vadd.f32 %v589_v40, %v516_v36 }
 0x2ab   : > { %662 = vrot.lane.b32.xlu0 %v588_v39, %s3462_s10  ;;  %v666_v49 = vmul.f32 %v588_v39, %v434_v46 }
 0x2ac   : > { %671 = vrot.lane.b32.xlu1 %v590_v42, %s3462_s10  ;;  %v675_v55 = vmul.f32 %v590_v42, %v434_v46 }
 0x2b0   : > { %673 = vrot.lane.b32.xlu1 %v590_v42, %s3463_s23 }
 0x2b4   : > { %664 = vrot.lane.b32.xlu1 %v588_v39, %s3463_s23 }
 0x31d   : > { %v663_v45 = vpop.permute.xlu0 %662 }
 0x31e   : > { %v672_v43 = vpop.permute.xlu1 %671  ;;  %v667_v48 = vmul.f32 %v2676_v44, %v663_v45 }
 0x31f   : > { %v676_v53 = vmul.f32 %v2676_v44, %v672_v43 }
 0x320   : > { %v668_v52 = vadd.f32 %v667_v48, %v666_v49 }
 0x321   : > { %v677_v58 = vadd.f32 %v676_v53, %v675_v55 }
 0x322   : > { %v674_v47 = vpop.permute.xlu1 %673 }
 0x323   : > { %v678_v56 = vmul.f32 %v2677_v50, %v674_v47 }
 0x325   : > { %v679_v60 = vadd.f32 %v678_v56, %v677_v58 }
 0x326   : > { %v665_v51 = vpop.permute.xlu1 %664 }
 0x327   : > { %v669_v54 = vmul.f32 %v2677_v50, %v665_v51 }
 0x329   : > { %v670_v57 = vadd.f32 %v669_v54, %v668_v52 }
 0x32b   : > { %687 = vrot.lane.b32.xlu0 %v670_v57, %s3464_s8  ;;  %681 = vrot.lane.b32.xlu1 %v670_v57, %s3465_s21 }
 0x32f   : > { %827 = vrot.lane.b32.xlu1 %v679_v60, %s3465_s21 }
 0x333   : > { %830 = vrot.lane.b32.xlu1 %v679_v60, %s3466_s24 }
 0x337   : > { %833 = vrot.lane.b32.xlu1 %v679_v60, %s3464_s8 }
 0x33b   : > { %684 = vrot.lane.b32.xlu1 %v670_v57, %s3466_s24 }
 0x39d   : > { %v682_v61 = vpop.permute.xlu1 %681  ;;  %v688_v12 = vpop.permute.xlu0 %687 }
 0x39e   : > { %v706_v20 = vcombine.low %v682_v61, %v688_v12  ;;  %v707_v22 = vcombine.high %v682_v61, %v688_v12 }
 0x3a0   : > { %v714_v42 = vrot.slane %v706_v20, %v3865_v11  ;;  %v721_v43 = vrot.slane %v707_v22, %v3865_v11 }
 0x3a1   : > { %v828_v62 = vpop.permute.xlu1 %827 }
 0x3a5   : > { %v831_v4 = vpop.permute.xlu1 %830 }
 0x3a6   : > { %v836_v8 = vcombine.low %v679_v60, %v831_v4  ;;  %v837_v9 = vcombine.high %v679_v60, %v831_v4 }
 0x3a8   : > { %v844_v16 = vrot.slane %v836_v8, %v3865_v11  ;;  %v851_v17 = vrot.slane %v837_v9, %v3865_v11 }
 0x3a9   : > { %v834_v10 = vpop.permute.xlu1 %833 }
 0x3aa   : > { %v852_v13 = vcombine.low %v828_v62, %v834_v10  ;;  %v853_v14 = vcombine.high %v828_v62, %v834_v10 }
 0x3ac   : > { %v860_v18 = vrot.slane %v852_v13, %v3865_v11  ;;  %v867_v19 = vrot.slane %v853_v14, %v3865_v11 }
 0x3ad   : > { %v685_v27 = vpop.permute.xlu1 %684 }
 0x3ae   : > { %v868_v28 = vcombine.low %v844_v16, %v860_v18  ;;  %v869_v30 = vcombine.high %v844_v16, %v860_v18  ;;  %v884_v31 = vcombine.low %v851_v17, %v867_v19  ;;  %v885_v32 = vcombine.high %v851_v17, %v867_v19 }
 0x3af   : > { %v690_v35 = vcombine.low %v670_v57, %v685_v27  ;;  %v691_v36 = vcombine.high %v670_v57, %v685_v27 }
 0x3b0   : > { %v876_v37 = vrot.slane %v868_v28, %v3868_v15  ;;  %v883_v39 = vrot.slane %v869_v30, %v3868_v15  ;;  %v892_v40 = vrot.slane %v884_v31, %v3868_v15  ;;  %v899_v41 = vrot.slane %v885_v32, %v3868_v15 }
 0x3b1   : > { %v698_v44 = vrot.slane %v690_v35, %v3865_v11  ;;  %v705_v45 = vrot.slane %v691_v36, %v3865_v11 }
 0x3b2   : > { %v904_v46 = vcombine.low %v876_v37, %v883_v39  ;;  %v2680_v47 = vcombine.high %v876_v37, %v883_v39  ;;  %v920_v48 = vcombine.low %v892_v40, %v899_v41  ;;  %v2681_v49 = vcombine.high %v892_v40, %v899_v41 }
 0x3b3   : > { %v722_v50 = vcombine.low %v698_v44, %v714_v42  ;;  %v723_v51 = vcombine.high %v698_v44, %v714_v42  ;;  %v738_v52 = vcombine.low %v705_v45, %v721_v43  ;;  %v739_v53 = vcombine.high %v705_v45, %v721_v43 }
 0x3b4   : > { %v911_v54 = vrot.slane %v904_v46, %v3865_v11  ;;  %v919_v55 = vrot.slane %v2680_v47, %v3865_v11  ;;  %v927_v56 = vrot.slane %v920_v48, %v3865_v11  ;;  %v935_v57 = vrot.slane %v2681_v49, %v3865_v11 }
 0x3b5   : > { %v730_v58 = vrot.slane %v722_v50, %v3868_v15  ;;  %v737_v60 = vrot.slane %v723_v51, %v3868_v15  ;;  %v746_v61 = vrot.slane %v738_v52, %v3868_v15  ;;  %v753_v62 = vrot.slane %v739_v53, %v3868_v15 }
 0x3b6   : > { %v936_v63 = vcombine.low %v911_v54, %v919_v55  ;;  %v952_v0 = vcombine.low %v927_v56, %v935_v57  ;;  %v937_v18 = vcombine.high %v911_v54, %v919_v55  ;;  %v953_v19 = vcombine.high %v927_v56, %v935_v57 }
 0x3b7   : > { %v758_v1 = vcombine.low %v730_v58, %v737_v60  ;;  %v2678_v3 = vcombine.high %v730_v58, %v737_v60  ;;  %v774_v4 = vcombine.low %v746_v61, %v753_v62  ;;  %v2679_v5 = vcombine.high %v746_v61, %v753_v62 }
 0x3b8   : > { %v944_v7 = vrot.slane %v936_v63, %v3868_v15  ;;  %v960_v8 = vrot.slane %v952_v0, %v3868_v15  ;;  %v951_v32 = vrot.slane %v937_v18, %v3868_v15  ;;  %v967_v35 = vrot.slane %v953_v19, %v3868_v15 }
 0x3b9   : > { %v765_v9 = vrot.slane %v758_v1, %v3865_v11  ;;  %v773_v10 = vrot.slane %v2678_v3, %v3865_v11  ;;  %v781_v12 = vrot.slane %v774_v4, %v3865_v11  ;;  %v789_v13 = vrot.slane %v2679_v5, %v3865_v11  ;;  %v3937_v1 = vld [vmem:[%s3741_s17 + $0x10] sm:$0xff] }
 0x3ba   : > { %v968_v14 = vcombine.low %v944_v7, %v960_v8  ;;  %v969_v31 = vcombine.high %v944_v7, %v960_v8  ;;  %v970_v40 = vcombine.low %v951_v32, %v967_v35  ;;  %v971_v42 = vcombine.high %v951_v32, %v967_v35 }
 0x3bb   : > { %v790_v16 = vcombine.low %v765_v9, %v773_v10  ;;  %v806_v17 = vcombine.low %v781_v12, %v789_v13  ;;  %v791_v27 = vcombine.high %v765_v9, %v773_v10  ;;  %v807_v28 = vcombine.high %v781_v12, %v789_v13 }
 0x3bc   : > { %2863 = vmatpush3.xpose.msk.msra.mxu1 %vm1118_vm1, %v968_v14  ;;  %v1430_v44 = vand.u32 127, %v451_v21  ;;  %v520_v3 = vrot.slane %v3937_v1, %v3838_v34 }
 0x3bd   : > { %2867 = vmatprep.subr.mxu1 %v3460_v59  ;;  %v798_v20 = vrot.slane %v790_v16, %v3868_v15  ;;  %v814_v22 = vrot.slane %v806_v17, %v3868_v15  ;;  %v805_v37 = vrot.slane %v791_v27, %v3868_v15  ;;  %v821_v39 = vrot.slane %v807_v28, %v3868_v15 }
 0x3be   : > { %vm1431_vm2 = vcmp.ge.s32.totalorder %v3816_v23, %v1430_v44  ;;  %v659_v4 = vadd.f32 %v3847_v38, %v520_v3 }
 0x3bf   : > { %v822_v30 = vcombine.low %v798_v20, %v814_v22  ;;  %v823_v36 = vcombine.high %v798_v20, %v814_v22  ;;  %v824_v41 = vcombine.low %v805_v37, %v821_v39  ;;  %v825_v43 = vcombine.high %v805_v37, %v821_v39 }
 0x3c1   : > { %2865 = vmatmul.mubr.msk.f32.vlgmr.msra.gmra.mrb[2].mxu1 %vm1118_vm1, %v822_v30 }
 0x3c2   : > { %2868 = vmatpush3.xpose.msk.msra.mxu1 %vm1118_vm1, %v969_v31  ;;  %2869 = vmatprep.mubr.msk.f32.mxu1 %vm3461_vm0, %v3460_v59 }
 0x3c3   : > { %2872 = vmatprep.subr.mxu1 %v3460_v59 }
 0x3c5   : > { %2870 = vmatmul.mubr.msk.f32.vlgmr.msra.gmra.mrb[4].mxu1 %vm1118_vm1, %v823_v36 }
 0x3c6   : > { %2873 = vmatpush3.xpose.msk.msra.mxu1 %vm1118_vm1, %v970_v40  ;;  %2874 = vmatprep.mubr.msk.f32.mxu1 %vm3461_vm0, %v3460_v59 }
 0x3c7   : > { %2877 = vmatprep.subr.mxu1 %v3460_v59 }
 0x3c9   : > { %2875 = vmatmul.mubr.msk.f32.vlgmr.msra.gmra.mrb[6].mxu1 %vm1118_vm1, %v824_v41 }
 0x3ca   : > { %2878 = vmatpush3.xpose.msk.msra.mxu1 %vm1118_vm1, %v971_v42  ;;  %2879 = vmatprep.mubr.msk.f32.mxu1 %vm3461_vm0, %v3460_v59 }
 0x3cb   : > { %2882 = vmatprep.subr.mxu1 %v3460_v59 }
 0x3cd   : > { %2880 = vmatmul.mubr.msk.f32.vlgmr.msra.gmra.mrb[8].mxu1 %vm1118_vm1, %v825_v43 }
 0x3ce   : > { %2884 = vmatprep.mubr.msk.f32.mxu1 %vm3461_vm0, %v3460_v59 }
 0x494   : > { %v1191_v45 = vpop.f32.mrb[2].mxu1 }
 0x495   : > { %v1423_v46 = vmul.f32 0.17677669, %v1191_v45  ;;  %v2866_v47 = vpop.f32.mrb[3].mxu1 }
 0x497   : > { %v1432_v48 = vsel %vm1431_vm2, %v1423_v46, -1e+30 }
 0x498   : > { %v1267_v49 = vpop.f32.mrb[4].mxu1  ;;  %v1437_v50 = vsel %vm1436_vm3, %v1432_v48, -inf }
 0x499   : > { %v1424_v51 = vmul.f32 0.17677669, %v1267_v49  ;;  %1438 = vmax.xlane.f32.xlu1 %v1437_v50  ;;  %v2871_v52 = vpop.f32.mrb[5].mxu1 }
 0x49b   : > { %v1433_v53 = vsel %vm1431_vm2, %v1424_v51, -1e+30 }
 0x49c   : > { %v1343_v21 = vpop.f32.mrb[6].mxu1  ;;  %v1440_v54 = vsel %vm1436_vm3, %v1433_v53, -inf }
 0x49d   : > { %v1425_v55 = vmul.f32 0.17677669, %v1343_v21  ;;  %1441 = vmax.xlane.f32.xlu0 %v1440_v54  ;;  %v2876_v56 = vpop.f32.mrb[7].mxu1 }
 0x49f   : > { %v1434_v57 = vsel %vm1431_vm2, %v1425_v55, -1e+30 }
 0x4a0   : > { %v1419_v58 = vpop.f32.mrb[8].mxu1  ;;  %v1443_v60 = vsel %vm1436_vm3, %v1434_v57, -inf }
 0x4a1   : > { %v1426_v61 = vmul.f32 0.17677669, %v1419_v58  ;;  %1444 = vmax.xlane.f32.xlu0 %v1443_v60  ;;  %v2881_v62 = vpop.f32.mrb[9].mxu1 }
 0x4a3   : > { %v1435_v63 = vsel %vm1431_vm2, %v1426_v61, -1e+30 }
 0x4a4   : > { %v1446_v0 = vsel %vm1436_vm3, %v1435_v63, -inf }
 0x4a5   : > { %1447 = vmax.xlane.f32.xlu1 %v1446_v0 }
 0x4b6   : > { %976 = vrot.lane.b32.xlu1 %v659_v4, %s3466_s24 }
 0x526   : > { %v1439_v5 = vpop.xlane.xlu1 %1438 }
 0x527   : > { %v1449_v7 = vsub.f32 %v1432_v48, %v1439_v5 }
 0x529   : > { %v1453_v8 = vmul.f32 1.442695, %v1449_v7 }
 0x52a   : > { %v1442_v9 = vpop.xlane.xlu0 %1441 }
 0x52b   : > { %3227 = vpow2.f32 %v1453_v8  ;;  %v1450_v10 = vsub.f32 %v1433_v53, %v1442_v9 }
 0x52d   : > { %v1455_v12 = vmul.f32 1.442695, %v1450_v10 }
 0x52e   : > { %v1445_v38 = vpop.xlane.xlu0 %1444 }
 0x52f   : > { %3229 = vpow2.f32 %v1455_v12  ;;  %v1451_v17 = vsub.f32 %v1434_v57, %v1445_v38 }
 0x531   : > { %v1457_v19 = vmul.f32 1.442695, %v1451_v17 }
 0x532   : > { %v1448_v18 = vpop.xlane.xlu1 %1447 }
 0x533   : > { %v1452_v20 = vsub.f32 %v1435_v63, %v1448_v18  ;;  %3231 = vpow2.f32 %v1457_v19 }
 0x535   : > { %v3228_v13 = vpop.eup %3227  ;;  %v1459_v22 = vmul.f32 1.442695, %v1452_v20 }
 0x536   : > { %v1461_v14 = vsel %vm1436_vm3, %v3228_v13, 0.0  ;;  %v977_v32 = vpop.permute.xlu1 %976 }
 0x537   : > { %1462 = vadd.xlane.f32.xlu0 %v1461_v14  ;;  %3233 = vpow2.f32 %v1459_v22  ;;  %v982_v37 = vcombine.low %v659_v4, %v977_v32  ;;  %v983_v39 = vcombine.high %v659_v4, %v977_v32  ;;  %v2031_v22 = vld [vmem:[%s3728_s18 + $0x28] sm:$0xff] }
 0x539   : > { %v3944_v16 = vpop.eup %3229  ;;  %v990_v44 = vrot.slane %v982_v37, %v3865_v11  ;;  %v997_v45 = vrot.slane %v983_v39, %v3865_v11  ;;  %v2035_v39 = vld [vmem:[%s3728_s18 + $0x48] sm:$0xff] }
 0x53a   : > { %v1464_v34 = vsel %vm1436_vm3, %v3944_v16, 0.0 }
 0x53b   : > { %1465 = vadd.xlane.f32.xlu1 %v1464_v34 }
 0x53d   : > { %v3950_v27 = vpop.eup %3231 }
 0x53e   : > { %v1467_v28 = vsel %vm1436_vm3, %v3950_v27, 0.0 }
 0x541   : > { %v3954_v30 = vpop.eup %3233 }
 0x542   : > { %v1470_v31 = vsel %vm1436_vm3, %v3954_v30, 0.0 }
 0x54c   : > { %979 = vrot.lane.b32.xlu1 %v659_v4, %s3464_s8 }
 0x54d   : > { %973 = vrot.lane.b32.xlu0 %v659_v4, %s3465_s21 }
 0x56c   : > { %1468 = vadd.xlane.f32.xlu0 %v1467_v28 }
 0x570   : > { %1471 = vadd.xlane.f32.xlu1 %v1470_v31 }
 0x5c4   : > { %v1463_v35 = vpop.xlane.xlu0 %1462 }
 0x5c5   : > { %3235 = vrcp.f32 %v1463_v35  ;;  %v2026_v35 = vld [vmem:[%s3728_s18] sm:$0xff] }
 0x5c8   : > { %v1466_v36 = vpop.xlane.xlu1 %1465  ;;  %v974_v40 = vpop.permute.xlu0 %973 }
 0x5c9   : > { %3237 = vrcp.f32 %v1466_v36  ;;  %v2030_v36 = vld [vmem:[%s3728_s18 + $0x20] sm:$0xff] }
 0x5cc   : > { %v980_v41 = vpop.permute.xlu1 %979 }
 0x5cd   : > { %v998_v42 = vcombine.low %v974_v40, %v980_v41  ;;  %v999_v43 = vcombine.high %v974_v40, %v980_v41  ;;  %v2039_v40 = vld [vmem:[%s3728_s18 + $0x68] sm:$0xff] }
 0x5cf   : > { %v1006_v46 = vrot.slane %v998_v42, %v3865_v11  ;;  %v1013_v47 = vrot.slane %v999_v43, %v3865_v11  ;;  %v3236_v4 = vpop.eup %3235  ;;  %v3019_v42 = vpack.c.bf16 %v2030_v36, %v2026_v35  ;;  %v3021_v43 = vpack.c.bf16 %v2039_v40, %v2035_v39  ;;  %v2301_v39 = vld [vmem:[%s3730_s13 + $0x88] sm:$0xff] }
 0x5d0   : > { %v1477_v14 = vmul.f32 %v3236_v4, %v3228_v13 }
 0x5d1   : > { %v1014_v48 = vcombine.low %v990_v44, %v1006_v46  ;;  %v1015_v49 = vcombine.high %v990_v44, %v1006_v46  ;;  %v1030_v50 = vcombine.low %v997_v45, %v1013_v47  ;;  %v1031_v51 = vcombine.high %v997_v45, %v1013_v47  ;;  %v2034_v44 = vld [vmem:[%s3728_s18 + $0x40] sm:$0xff]  ;;  %v2043_v46 = vld [vmem:[%s3728_s18 + $0x88] sm:$0xff] }
 0x5d2   : > { %v2038_v45 = vld [vmem:[%s3728_s18 + $0x60] sm:$0xff]  ;;  %v2047_v47 = vld [vmem:[%s3728_s18 + $0xa8] sm:$0xff] }
 0x5d3   : > { %v1022_v52 = vrot.slane %v1014_v48, %v3868_v15  ;;  %v1029_v53 = vrot.slane %v1015_v49, %v3868_v15  ;;  %v1038_v21 = vrot.slane %v1030_v50, %v3868_v15  ;;  %v1045_v54 = vrot.slane %v1031_v51, %v3868_v15  ;;  %v3238_v12 = vpop.eup %3237  ;;  %v2046_v50 = vld [vmem:[%s3728_s18 + $0xa0] sm:$0xff]  ;;  %v2051_v51 = vld [vmem:[%s3728_s18 + $0xc8] sm:$0xff] }
 0x5d4   : > { %v1478_v18 = vmul.f32 %v3238_v12, %v3944_v16  ;;  %v2027_v16 = vld [vmem:[%s3728_s18 + $0x8] sm:$0xff]  ;;  %v3023_v48 = vpack.c.bf16 %v2038_v45, %v2034_v44  ;;  %v3025_v49 = vpack.c.bf16 %v2047_v47, %v2043_v46  ;;  %v2286_v44 = vld [vmem:[%s3730_s13 + $0x10] sm:$0xff]  ;;  %v2287_v45 = vld [vmem:[%s3730_s13 + $0x18] sm:$0xff] }
 0x5d5   : > { %v1050_v55 = vcombine.low %v1022_v52, %v1029_v53  ;;  %v2682_v56 = vcombine.high %v1022_v52, %v1029_v53  ;;  %v1066_v57 = vcombine.low %v1038_v21, %v1045_v54  ;;  %v2683_v58 = vcombine.high %v1038_v21, %v1045_v54  ;;  %v2055_v52 = vld [vmem:[%s3728_s18 + $0xe8] sm:$0xff]  ;;  %v2050_v54 = vld [vmem:[%s3728_s18 + $0xc0] sm:$0xff] }
 0x5d6   : > { %v3017_v32 = vpack.c.bf16 %v2031_v22, %v2027_v16  ;;  %v3029_v21 = vpack.c.bf16 %v2055_v52, %v2051_v51  ;;  %v2086_v16 = vld [vmem:[%s3728_s18 + $0x1e0] sm:$0xff]  ;;  %v3087_v46 = vpack.c.bf16 %v2287_v45, %v2286_v44  ;;  %v2306_v52 = vld [vmem:[%s3730_s13 + $0xb0] sm:$0xff] }
 0x5d7   : > { %v1057_v60 = vrot.slane %v1050_v55, %v3865_v11  ;;  %v1065_v61 = vrot.slane %v2682_v56, %v3865_v11  ;;  %v1073_v62 = vrot.slane %v1066_v57, %v3865_v11  ;;  %v1081_v63 = vrot.slane %v2683_v58, %v3865_v11  ;;  %v2054_v55 = vld [vmem:[%s3728_s18 + $0xe0] sm:$0xff]  ;;  %v2059_v56 = vld [vmem:[%s3728_s18 + $0x108] sm:$0xff]  ;;  %v1936_v45 = vld [vmem:[%s3722_s22 + $0x50] sm:$0xff] }
 0x5d8   : > { %v2063_v57 = vld [vmem:[%s3728_s18 + $0x128] sm:$0xff]  ;;  %v3031_v58 = vpack.c.bf16 %v2054_v55, %v2050_v54  ;;  %v2304_v47 = vld [vmem:[%s3730_s13 + $0xa0] sm:$0xff]  ;;  %v2290_v54 = vld [vmem:[%s3730_s13 + $0x30] sm:$0xff] }
 0x5d9   : > { %v1082_v0 = vcombine.low %v1057_v60, %v1065_v61  ;;  %v1098_v3 = vcombine.low %v1073_v62, %v1081_v63  ;;  %v1083_v8 = vcombine.high %v1057_v60, %v1065_v61  ;;  %v1099_v9 = vcombine.high %v1073_v62, %v1081_v63  ;;  %v2058_v61 = vld [vmem:[%s3728_s18 + $0x100] sm:$0xff]  ;;  %v2067_v63 = vld [vmem:[%s3728_s18 + $0x148] sm:$0xff]  ;;  %v2291_v55 = vld [vmem:[%s3730_s13 + $0x38] sm:$0xff] }
 0x5da   : > { %v3033_v60 = vpack.c.bf16 %v2063_v57, %v2059_v56  ;;  %v2062_v62 = vld [vmem:[%s3728_s18 + $0x120] sm:$0xff]  ;;  %v3095_v56 = vpack.c.bf16 %v2291_v55, %v2290_v54 }
 0x5db   : > { %v1090_v5 = vrot.slane %v1082_v0, %v3868_v15  ;;  %v1106_v7 = vrot.slane %v1098_v3, %v3868_v15  ;;  %v1097_v38 = vrot.slane %v1083_v8, %v3868_v15  ;;  %v1113_v17 = vrot.slane %v1099_v9, %v3868_v15  ;;  %v2071_v0 = vld [vmem:[%s3728_s18 + $0x168] sm:$0xff]  ;;  %v2308_v57 = vld [vmem:[%s3730_s13 + $0xc0] sm:$0xff] }
 0x5dc   : > { %v3035_v3 = vpack.c.bf16 %v2062_v62, %v2058_v61  ;;  %v3037_v4 = vpack.c.bf16 %v2071_v0, %v2067_v63  ;;  %v2075_v8 = vld [vmem:[%s3728_s18 + $0x188] sm:$0xff]  ;;  %v2310_v63 = vld [vmem:[%s3730_s13 + $0xd0] sm:$0xff]  ;;  %v2311_v0 = vld [vmem:[%s3730_s13 + $0xd8] sm:$0xff] }
 0x5dd   : > { %v1114_v10 = vcombine.low %v1090_v5, %v1106_v7  ;;  %v1115_v34 = vcombine.high %v1090_v5, %v1106_v7  ;;  %v1116_v13 = vcombine.low %v1097_v38, %v1113_v17  ;;  %v1117_v37 = vcombine.high %v1097_v38, %v1113_v17  ;;  %v2066_v5 = vld [vmem:[%s3728_s18 + $0x140] sm:$0xff]  ;;  %v2079_v9 = vld [vmem:[%s3728_s18 + $0x1a8] sm:$0xff] }
 0x5de   : > { %v2070_v7 = vld [vmem:[%s3728_s18 + $0x160] sm:$0xff]  ;;  %v3041_v12 = vpack.c.bf16 %v2079_v9, %v2075_v8  ;;  %v2018_v38 = vsub.s32 2, %v3816_v23  ;;  %v2083_v17 = vld [vmem:[%s3728_s18 + $0x1c8] sm:$0xff] }
 0x5df   : > { %2883 = vmatpush3.msra.mxu1 %v1114_v10  ;;  %v3039_v10 = vpack.c.bf16 %v2070_v7, %v2066_v5  ;;  %v2293_v62 = vld [vmem:[%s3730_s13 + $0x48] sm:$0xff]  ;;  %v2294_v5 = vld [vmem:[%s3730_s13 + $0x50] sm:$0xff]  ;;  %v2295_v7 = vld [vmem:[%s3730_s13 + $0x58] sm:$0xff] }
 0x5e0   : > { %2885 = vmatmul.mubr.msk.f32.vlgmr.msra.gmra.mrb[10].mxu1 %vm1436_vm3, %v1477_v14  ;;  %2887 = vmatprep.subr.mxu1 %v3460_v59  ;;  %v2074_v14 = vld [vmem:[%s3728_s18 + $0x180] sm:$0xff]  ;;  %v2019_v22 = vrot.slane %v3820_v25, %v2018_v38  ;;  %v2313_v9 = vld [vmem:[%s3730_s13 + $0xe8] sm:$0xff]  ;;  %v2314_v38 = vld [vmem:[%s3730_s13 + $0xf0] sm:$0xff] }
 0x5e1   : > { %2888 = vmatpush3.msra.mxu1 %v1115_v34  ;;  %2889 = vmatprep.mubr.msk.f32.mxu1 %vm3461_vm0, %v3460_v59  ;;  %v2078_v34 = vld [vmem:[%s3728_s18 + $0x1a0] sm:$0xff] }
 0x5e2   : > { %2892 = vmatprep.subr.mxu1 %v3460_v59  ;;  %v2312_v8 = vld [vmem:[%s3730_s13 + $0xe0] sm:$0xff] }
 0x5e4   : > { %2890 = vmatmul.mubr.msk.f32.vlgmr.msra.gmra.mrb[12].mxu1 %vm1436_vm3, %v1478_v18  ;;  %v2087_v18 = vld [vmem:[%s3728_s18 + $0x1e8] sm:$0xff] }
 0x5e5   : > { %2893 = vmatpush3.msra.mxu1 %v1116_v13  ;;  %2894 = vmatprep.mubr.msk.f32.mxu1 %vm3461_vm0, %v3460_v59  ;;  %v3043_v13 = vpack.c.bf16 %v2078_v34, %v2074_v14  ;;  %v2296_v14 = vld [vmem:[%s3730_s13 + $0x60] sm:$0xff]  ;;  %v2297_v34 = vld [vmem:[%s3730_s13 + $0x68] sm:$0xff] }
 0x5e6   : > { %2897 = vmatprep.subr.mxu1 %v3460_v59 }
 0x5f9   : > { %v1469_v19 = vpop.xlane.xlu0 %1468 }
 0x5fa   : > { %3239 = vrcp.f32 %v1469_v19  ;;  %v3045_v19 = vpack.c.bf16 %v2087_v18, %v2083_v17  ;;  %v2315_v17 = vld [vmem:[%s3730_s13 + $0xf8] sm:$0xff]  ;;  %v3107_v18 = vpack.c.bf16 %v2297_v34, %v2296_v14 }
 0x5fd   : > { %v1472_v20 = vpop.xlane.xlu1 %1471 }
 0x5fe   : > { %3241 = vrcp.f32 %v1472_v20  ;;  %v2082_v20 = vld [vmem:[%s3728_s18 + $0x1c0] sm:$0xff] }
 0x604   : > { %v3240_v28 = vpop.eup %3239 }
 0x605   : > { %v1479_v31 = vmul.f32 %v3240_v28, %v3950_v27  ;;  %v2023_v28 = vsub.s32 3, %v3816_v23 }
 0x607   : > { %2895 = vmatmul.mubr.msk.f32.vlgmr.msra.gmra.mrb[14].mxu1 %vm1436_vm3, %v1479_v31  ;;  %v3047_v31 = vpack.c.bf16 %v2086_v16, %v2082_v20  ;;  %v2024_v35 = vrot.slane %v3820_v25, %v2023_v28  ;;  %v2303_v25 = vld [vmem:[%s3730_s13 + $0x98] sm:$0xff]  ;;  %v1927_v28 = vld [vmem:[%s3722_s22 + $0x8] sm:$0xff] }
 0x608   : > { %v3242_v41 = vpop.eup %3241  ;;  %2898 = vmatpush3.msra.mxu1 %v1117_v37  ;;  %2899 = vmatprep.mubr.msk.f32.mxu1 %vm3461_vm0, %v3460_v59  ;;  %v2300_v37 = vld [vmem:[%s3730_s13 + $0x80] sm:$0xff]  ;;  %v2299_v20 = vld [vmem:[%s3730_s13 + $0x78] sm:$0xff] }
 0x609   : > { %v1480_v27 = vmul.f32 %v3242_v41, %v3954_v30  ;;  %3018 = vmatprep.subr.bf16.mxu1 %v3017_v32  ;;  %v2042_v30 = vld [vmem:[%s3728_s18 + $0x80] sm:$0xff]  ;;  %v2020_v32 = vmul.f32 %v2019_v22, %v3827_v29  ;;  %v3081_v40 = vpack.c.bf16 %v2301_v39, %v2300_v37  ;;  %v2302_v29 = vld [vmem:[%s3730_s13 + $0x90] sm:$0xff] }
 0x60a   : > { %v3027_v53 = vpack.c.bf16 %v2046_v50, %v2042_v30  ;;  %v2284_v41 = vld [vmem:[%s3730_s13] sm:$0xff]  ;;  %v2289_v50 = vld [vmem:[%s3730_s13 + $0x28] sm:$0xff] }
 0x60b   : > { %2900 = vmatmul.mubr.msk.f32.vlgmr.msra.gmra.mrb[16].mxu1 %vm1436_vm3, %v1480_v27  ;;  %v4028_v36 = vadd.f32 %v2024_v35, %v2020_v32  ;;  %v2288_v30 = vld [vmem:[%s3730_s13 + $0x20] sm:$0xff]  ;;  %v1929_v35 = vld [vmem:[%s3722_s22 + $0x18] sm:$0xff] }
 0x60c   : > { %3020 = vmatpush1.bf16.msra.mxu1 %v3019_v42  ;;  %2170 = vmatprep.mubr.f32.mxu1 %v3460_v59  ;;  %v2285_v42 = vld [vmem:[%s3730_s13 + $0x8] sm:$0xff]  ;;  %v3091_v51 = vpack.c.bf16 %v2289_v50, %v2288_v30  ;;  %v1926_v22 = vld [vmem:[%s3722_s22] sm:$0xff] }
 0x60d   : > { %3022 = vmatprep.subr.bf16.mxu1 %v3021_v43  ;;  %v3083_v27 = vpack.c.bf16 %v2285_v42, %v2284_v41  ;;  %v3085_v43 = vpack.c.bf16 %v2303_v25, %v2302_v29  ;;  %v2994_v32 = vpack.c.bf16 %v1927_v28, %v1926_v22  ;;  %v1930_v39 = vld [vmem:[%s3722_s22 + $0x20] sm:$0xff]  ;;  %v1932_v42 = vld [vmem:[%s3722_s22 + $0x30] sm:$0xff] }
 0x60e   : > { %v1934_v25 = vld [vmem:[%s3722_s22 + $0x40] sm:$0xff] }
 0x60f   : > { %2995 = vmatpush3.bf16.msra.mxu0 %v2994_v32 }
 0x610   : > { %3024 = vmatpush1.bf16.msra.mxu1 %v3023_v48  ;;  %v2305_v48 = vld [vmem:[%s3730_s13 + $0xa8] sm:$0xff]  ;;  %2996 = vmatprep.subr.bf16.mxu0 %v3459_v6 }
 0x611   : > { %3026 = vmatprep.subr.bf16.mxu1 %v3025_v49  ;;  %v3089_v49 = vpack.c.bf16 %v2305_v48, %v2304_v47  ;;  %v1938_v48 = vld [vmem:[%s3722_s22 + $0x60] sm:$0xff] }
 0x614   : > { %3028 = vmatpush1.bf16.msra.mxu1 %v3027_v53  ;;  %v2307_v53 = vld [vmem:[%s3730_s13 + $0xb8] sm:$0xff] }
 0x615   : > { %3030 = vmatprep.subr.bf16.mxu1 %v3029_v21  ;;  %v3093_v21 = vpack.c.bf16 %v2307_v53, %v2306_v52 }
 0x618   : > { %3032 = vmatpush1.bf16.msra.mxu1 %v3031_v58  ;;  %v2309_v58 = vld [vmem:[%s3730_s13 + $0xc8] sm:$0xff] }
 0x619   : > { %3034 = vmatprep.subr.bf16.mxu1 %v3033_v60  ;;  %v2292_v60 = vld [vmem:[%s3730_s13 + $0x40] sm:$0xff]  ;;  %v3097_v61 = vpack.c.bf16 %v2309_v58, %v2308_v57 }
 0x61c   : > { %3036 = vmatpush1.bf16.msra.mxu1 %v3035_v3  ;;  %v3099_v3 = vpack.c.bf16 %v2293_v62, %v2292_v60 }
 0x61d   : > { %3038 = vmatprep.subr.bf16.mxu1 %v3037_v4  ;;  %v3101_v4 = vpack.c.bf16 %v2311_v0, %v2310_v63 }
 0x620   : > { %3040 = vmatpush1.bf16.msra.mxu1 %v3039_v10  ;;  %v3103_v10 = vpack.c.bf16 %v2295_v7, %v2294_v5 }
 0x621   : > { %3042 = vmatprep.subr.bf16.mxu1 %v3041_v12  ;;  %v3105_v12 = vpack.c.bf16 %v2313_v9, %v2312_v8  ;;  %v1940_v8 = vld [vmem:[%s3722_s22 + $0x70] sm:$0xff]  ;;  %v1941_v9 = vld [vmem:[%s3722_s22 + $0x78] sm:$0xff] }
 0x624   : > { %3044 = vmatpush1.bf16.msra.mxu1 %v3043_v13  ;;  %v3109_v13 = vpack.c.bf16 %v2315_v17, %v2314_v38  ;;  %v2029_v17 = vld [vmem:[%s3728_s18 + $0x18] sm:$0xff] }
 0x625   : > { %3046 = vmatprep.subr.bf16.mxu1 %v3045_v19  ;;  %v2298_v19 = vld [vmem:[%s3730_s13 + $0x70] sm:$0xff] }
 0x626   : > { %v3111_v16 = vpack.c.bf16 %v2299_v20, %v2298_v19 }
 0x628   : > { %3048 = vmatpush1.bf16.msra.mxu1 %v3047_v31  ;;  %v1928_v31 = vld [vmem:[%s3722_s22 + $0x10] sm:$0xff] }
 0x629   : > { %3082 = vmatprep.subr.bf16.mxu1 %v3081_v40  ;;  %v2997_v37 = vpack.c.bf16 %v1929_v35, %v1928_v31  ;;  %v1931_v40 = vld [vmem:[%s3722_s22 + $0x28] sm:$0xff] }
 0x62a   : > { %v3000_v41 = vpack.c.bf16 %v1931_v40, %v1930_v39 }
 0x62b   : > { %2171 = vmatmul.mubr.f32.vlgmr.msra.gmra.mrb[18].mxu1 %v4028_v36  ;;  %2998 = vmatpush3.bf16.msra.mxu0 %v2997_v37 }
 0x62c   : > { %3084 = vmatpush3.bf16.msra.mxu1 %v3083_v27  ;;  %2999 = vmatprep.subr.bf16.mxu0 %v3459_v6  ;;  %v1933_v27 = vld [vmem:[%s3722_s22 + $0x38] sm:$0xff] }
 0x62d   : > { %3086 = vmatprep.subr.bf16.mxu1 %v3085_v43  ;;  %v3003_v29 = vpack.c.bf16 %v1933_v27, %v1932_v42  ;;  %v1935_v43 = vld [vmem:[%s3722_s22 + $0x48] sm:$0xff] }
 0x62e   : > { %v3006_v44 = vpack.c.bf16 %v1935_v43, %v1934_v25 }
 0x62f   : > { %3001 = vmatpush3.bf16.msra.mxu0 %v3000_v41 }
 0x630   : > { %3088 = vmatpush3.bf16.msra.mxu1 %v3087_v46  ;;  %3002 = vmatprep.subr.bf16.mxu0 %v3459_v6  ;;  %v1937_v46 = vld [vmem:[%s3722_s22 + $0x58] sm:$0xff] }
 0x631   : > { %3090 = vmatprep.subr.bf16.mxu1 %v3089_v49  ;;  %v3009_v47 = vpack.c.bf16 %v1937_v46, %v1936_v45  ;;  %v1939_v49 = vld [vmem:[%s3722_s22 + $0x68] sm:$0xff] }
 0x633   : > { %3004 = vmatpush3.bf16.msra.mxu0 %v3003_v29 }
 0x634   : > { %3092 = vmatpush3.bf16.msra.mxu1 %v3091_v51  ;;  %3005 = vmatprep.subr.bf16.mxu0 %v3459_v6  ;;  %v3012_v51 = vpack.c.bf16 %v1939_v49, %v1938_v48 }
 0x635   : > { %3094 = vmatprep.subr.bf16.mxu1 %v3093_v21 }
 0x637   : > { %3007 = vmatpush3.bf16.msra.mxu0 %v3006_v44 }
 0x638   : > { %3096 = vmatpush3.bf16.msra.mxu1 %v3095_v56  ;;  %3008 = vmatprep.subr.bf16.mxu0 %v3459_v6 }
 0x639   : > { %3098 = vmatprep.subr.bf16.mxu1 %v3097_v61 }
 0x63b   : > { %3010 = vmatpush3.bf16.msra.mxu0 %v3009_v47  ;;  %v4111_v47 = vld [vmem:[%s3741_s17] sm:$0xff] }
 0x63c   : > { %3100 = vmatpush3.bf16.msra.mxu1 %v3099_v3  ;;  %3011 = vmatprep.subr.bf16.mxu0 %v3459_v6 }
 0x63d   : > { %3102 = vmatprep.subr.bf16.mxu1 %v3101_v4 }
 0x63f   : > { %3013 = vmatpush3.bf16.msra.mxu0 %v3012_v51 }
 0x640   : > { %3104 = vmatpush3.bf16.msra.mxu1 %v3103_v10  ;;  %3014 = vmatprep.subr.bf16.mxu0 %v3459_v6  ;;  %v3015_v10 = vpack.c.bf16 %v1941_v9, %v1940_v8  ;;  %v2028_v8 = vld [vmem:[%s3728_s18 + $0x10] sm:$0xff] }
 0x641   : > { %3106 = vmatprep.subr.bf16.mxu1 %v3105_v12  ;;  %v2032_v9 = vld [vmem:[%s3728_s18 + $0x30] sm:$0xff] }
 0x643   : > { %3016 = vmatpush3.bf16.msra.mxu0 %v3015_v10 }
 0x644   : > { %3108 = vmatpush3.bf16.msra.mxu1 %v3107_v18  ;;  %v2033_v18 = vld [vmem:[%s3728_s18 + $0x38] sm:$0xff] }
 0x645   : > { %3110 = vmatprep.subr.bf16.mxu1 %v3109_v13  ;;  %v3049_v22 = vpack.c.bf16 %v2033_v18, %v2029_v17 }
 0x647   : > { %3050 = vmatprep.subr.bf16.mxu0 %v3049_v22  ;;  %v2045_v22 = vld [vmem:[%s3728_s18 + $0x98] sm:$0xff] }
 0x648   : > { %3112 = vmatpush3.bf16.msra.mxu1 %v3111_v16 }
 0x6b3   : > { %v1550_v30 = vpop.f32.mrb[10].mxu1 }
 0x6b4   : > { %v2886_v50 = vpop.f32.mrb[11].mxu1 }
 0x6b7   : > { %v1623_v52 = vpop.f32.mrb[12].mxu1 }
 0x6b8   : > { %v2891_v53 = vpop.f32.mrb[13].mxu1 }
 0x6da   : > { %v1696_v21 = vpop.f32.mrb[14].mxu1 }
 0x6db   : > { %v1773_v54 = vcombine.low %v1550_v30, %v1696_v21  ;;  %v1774_v55 = vcombine.high %v1550_v30, %v1696_v21  ;;  %v2896_v56 = vpop.f32.mrb[15].mxu1 }
 0x6dd   : > { %v1781_v62 = vrot.slane %v1773_v54, %v3865_v11  ;;  %v1788_v63 = vrot.slane %v1774_v55, %v3865_v11 }
 0x6de   : > { %v1769_v57 = vpop.f32.mrb[16].mxu1 }
 0x6df   : > { %v1789_v58 = vcombine.low %v1623_v52, %v1769_v57  ;;  %v1790_v60 = vcombine.high %v1623_v52, %v1769_v57  ;;  %v2901_v61 = vpop.f32.mrb[17].mxu1 }
 0x6e1   : > { %v1797_v0 = vrot.slane %v1789_v58, %v3865_v11  ;;  %v1804_v6 = vrot.slane %v1790_v60, %v3865_v11 }
 0x6e3   : > { %v1805_v3 = vcombine.low %v1781_v62, %v1797_v0  ;;  %v1806_v4 = vcombine.high %v1781_v62, %v1797_v0  ;;  %v1821_v5 = vcombine.low %v1788_v63, %v1804_v6  ;;  %v1822_v7 = vcombine.high %v1788_v63, %v1804_v6 }
 0x6e5   : > { %v1813_v12 = vrot.slane %v1805_v3, %v3868_v15  ;;  %v1820_v14 = vrot.slane %v1806_v4, %v3868_v15  ;;  %v1829_v34 = vrot.slane %v1821_v5, %v3868_v15  ;;  %v1836_v38 = vrot.slane %v1822_v7, %v3868_v15 }
 0x6e7   : > { %v1841_v13 = vcombine.low %v1813_v12, %v1820_v14  ;;  %v2696_v19 = vcombine.high %v1813_v12, %v1820_v14  ;;  %v1857_v20 = vcombine.low %v1829_v34, %v1836_v38  ;;  %v2697_v16 = vcombine.high %v1829_v34, %v1836_v38  ;;  %v2037_v14 = vld [vmem:[%s3728_s18 + $0x58] sm:$0xff] }
 0x6e8   : > { %v2041_v34 = vld [vmem:[%s3728_s18 + $0x78] sm:$0xff]  ;;  %v3051_v38 = vpack.c.bf16 %v2032_v9, %v2028_v8  ;;  %v2334_v8 = vld [vmem:[%s3730_s13 + $0x190] sm:$0xff] }
 0x6e9   : > { %v1848_v28 = vrot.slane %v1841_v13, %v3865_v11  ;;  %v1856_v31 = vrot.slane %v2696_v19, %v3865_v11  ;;  %v1864_v32 = vrot.slane %v1857_v20, %v3865_v11  ;;  %v1872_v35 = vrot.slane %v2697_v16, %v3865_v11  ;;  %v2036_v19 = vld [vmem:[%s3728_s18 + $0x50] sm:$0xff]  ;;  %v2335_v9 = vld [vmem:[%s3730_s13 + $0x198] sm:$0xff] }
 0x6ea   : > { %v4108_v11 = vsub.s32 6, %v3816_v23  ;;  %v3053_v13 = vpack.c.bf16 %v2041_v34, %v2037_v14  ;;  %v2040_v20 = vld [vmem:[%s3728_s18 + $0x70] sm:$0xff]  ;;  %v2336_v34 = vld [vmem:[%s3730_s13 + $0x1a0] sm:$0xff] }
 0x6eb   : > { %v1874_v37 = vcombine.high %v1848_v28, %v1856_v31  ;;  %v1890_v39 = vcombine.high %v1864_v32, %v1872_v35  ;;  %v1873_v40 = vcombine.low %v1848_v28, %v1856_v31  ;;  %v1889_v41 = vcombine.low %v1864_v32, %v1872_v35  ;;  %v2049_v28 = vld [vmem:[%s3728_s18 + $0xb8] sm:$0xff]  ;;  %v2044_v35 = vld [vmem:[%s3728_s18 + $0x90] sm:$0xff] }
 0x6ec   : > { %v2093_v48 = vrot.slane %v4111_v47, %v4108_v11  ;;  %v3055_v31 = vpack.c.bf16 %v2040_v20, %v2036_v19  ;;  %v3057_v32 = vpack.c.bf16 %v2049_v28, %v2045_v22  ;;  %v2338_v20 = vld [vmem:[%s3730_s13 + $0x1b0] sm:$0xff] }
 0x6ed   : > { %v1888_v42 = vrot.slane %v1874_v37, %v3868_v15  ;;  %v1904_v27 = vrot.slane %v1890_v39, %v3868_v15  ;;  %v1881_v29 = vrot.slane %v1873_v40, %v3868_v15  ;;  %v1897_v25 = vrot.slane %v1889_v41, %v3868_v15  ;;  %v2048_v37 = vld [vmem:[%s3728_s18 + $0xb0] sm:$0xff]  ;;  %v2053_v39 = vld [vmem:[%s3728_s18 + $0xd8] sm:$0xff] }
 0x6ee   : > { %v2097_v15 = vrot.slane %v3841_v33, %v4108_v11  ;;  %v2057_v40 = vld [vmem:[%s3728_s18 + $0xf8] sm:$0xff]  ;;  %v3059_v41 = vpack.c.bf16 %v2048_v37, %v2044_v35  ;;  %v2322_v28 = vld [vmem:[%s3730_s13 + $0x130] sm:$0xff]  ;;  %v2340_v35 = vld [vmem:[%s3730_s13 + $0x1c0] sm:$0xff] }
 0x6ef   : > { %v1907_v43 = vcombine.low %v1888_v42, %v1904_v27  ;;  %v1906_v44 = vcombine.high %v1881_v29, %v1897_v25  ;;  %v1908_v45 = vcombine.high %v1888_v42, %v1904_v27  ;;  %v1905_v46 = vcombine.low %v1881_v29, %v1897_v25  ;;  %v2052_v27 = vld [vmem:[%s3728_s18 + $0xd0] sm:$0xff]  ;;  %v2061_v25 = vld [vmem:[%s3728_s18 + $0x118] sm:$0xff]  ;;  %v2341_v37 = vld [vmem:[%s3730_s13 + $0x1c8] sm:$0xff] }
 0x6f0   : > { %v3061_v42 = vpack.c.bf16 %v2057_v40, %v2053_v39  ;;  %v2056_v29 = vld [vmem:[%s3728_s18 + $0xf0] sm:$0xff]  ;;  %v2324_v39 = vld [vmem:[%s3730_s13 + $0x140] sm:$0xff]  ;;  %v3129_v40 = vpack.c.bf16 %v2341_v37, %v2340_v35 }
 0x6f1   : > { %1914 = vrot.lane.b32.xlu1 %v1907_v43, %s3466_s24  ;;  %1910 = vrot.lane.b32.xlu0 %v1906_v44, %s3464_s8  ;;  %v3063_v43 = vpack.c.bf16 %v2056_v29, %v2052_v27  ;;  %v2343_v27 = vld [vmem:[%s3730_s13 + $0x1d8] sm:$0xff] }
 0x6f5   : > { %1918 = vrot.lane.b32.xlu0 %v1908_v45, %s3465_s21  ;;  %v2060_v45 = vld [vmem:[%s3728_s18 + $0x110] sm:$0xff] }
 0x6fe   : > { %v2172_v49 = vpop.f32.mrb[18].mxu1 }
 0x6ff   : > { %v2173_v30 = vadd.f32 %v2172_v49, %v2093_v48  ;;  %v2174_v50 = vpop.f32.mrb[19].mxu1  ;;  %v2069_v48 = vld [vmem:[%s3728_s18 + $0x158] sm:$0xff] }
 0x700   : > { %v2175_v51 = vadd.f32 %v2174_v50, %v2097_v15  ;;  %v2073_v15 = vld [vmem:[%s3728_s18 + $0x178] sm:$0xff]  ;;  %v2068_v50 = vld [vmem:[%s3728_s18 + $0x150] sm:$0xff] }
 0x701   : > { %v2248_v52 = vmul.f32 %v2173_v30, %v2173_v30 }
 0x702   : > { %v2249_v53 = vmul.f32 %v2175_v51, %v2175_v51 }
 0x703   : > { %v2252_v21 = vmul.f32 %v2248_v52, %v2173_v30  ;;  %v2077_v52 = vld [vmem:[%s3728_s18 + $0x198] sm:$0xff] }
 0x704   : > { %v2253_v54 = vmul.f32 %v2249_v53, %v2175_v51  ;;  %v2081_v53 = vld [vmem:[%s3728_s18 + $0x1b8] sm:$0xff] }
 0x705   : > { %v2256_v55 = vmul.f32 0.044715, %v2252_v21 }
 0x706   : > { %v2257_v56 = vmul.f32 0.044715, %v2253_v54  ;;  %v3073_v54 = vpack.c.bf16 %v2081_v53, %v2077_v52 }
 0x707   : > { %v2260_v57 = vadd.f32 %v2256_v55, %v2173_v30  ;;  %v2076_v55 = vld [vmem:[%s3728_s18 + $0x190] sm:$0xff] }
 0x708   : > { %v2261_v58 = vadd.f32 %v2257_v56, %v2175_v51  ;;  %v2080_v56 = vld [vmem:[%s3728_s18 + $0x1b0] sm:$0xff] }
 0x709   : > { %v2264_v60 = vmul.f32 0.7978846, %v2260_v57  ;;  %v2085_v57 = vld [vmem:[%s3728_s18 + $0x1d8] sm:$0xff] }
 0x70a   : > { %v2265_v61 = vmul.f32 0.7978846, %v2261_v58  ;;  %v2089_v58 = vld [vmem:[%s3728_s18 + $0x1f8] sm:$0xff] }
 0x70b   : > { %3243 = vtanh.f32 %v2264_v60  ;;  %v3075_v60 = vpack.c.bf16 %v2080_v56, %v2076_v55  ;;  %v2331_v55 = vld [vmem:[%s3730_s13 + $0x178] sm:$0xff] }
 0x70c   : > { %3245 = vtanh.f32 %v2265_v61  ;;  %v3077_v61 = vpack.c.bf16 %v2089_v58, %v2085_v57 }
 0x715   : > { %v3244_v62 = vpop.eup %3243 }
 0x716   : > { %v3246_v33 = vpop.eup %3245  ;;  %v2272_v63 = vadd.f32 1.0, %v3244_v62  ;;  %v2084_v62 = vld [vmem:[%s3728_s18 + $0x1d0] sm:$0xff] }
 0x717   : > { %v2273_v0 = vadd.f32 1.0, %v3246_v33  ;;  %v2088_v33 = vld [vmem:[%s3728_s18 + $0x1f0] sm:$0xff] }
 0x718   : > { %v2276_v6 = vmul.f32 0.5, %v2272_v63  ;;  %v3079_v63 = vpack.c.bf16 %v2088_v33, %v2084_v62  ;;  %v2101_v62 = vrot.slane %v3937_v1, %v4108_v11 }
 0x719   : > { %v2277_v3 = vmul.f32 0.5, %v2273_v0  ;;  %v2332_v0 = vld [vmem:[%s3730_s13 + $0x180] sm:$0xff] }
 0x71a   : > { %v2280_v5 = vmul.f32 %v2276_v6, %v2173_v30  ;;  %v3069_v30 = vpack.c.bf16 %v2073_v15, %v2069_v48  ;;  %v2333_v6 = vld [vmem:[%s3730_s13 + $0x188] sm:$0xff]  ;;  %v2328_v15 = vld [vmem:[%s3730_s13 + $0x160] sm:$0xff] }
 0x71b   : > { %v2281_v4 = vmul.f32 %v2277_v3, %v2175_v51  ;;  %v2072_v51 = vld [vmem:[%s3728_s18 + $0x170] sm:$0xff]  ;;  %v3113_v3 = vpack.c.bf16 %v2333_v6, %v2332_v0 }
 0x71c   : > { %v3071_v21 = vpack.c.bf16 %v2072_v51, %v2068_v50  ;;  %v2347_v50 = vld [vmem:[%s3730_s13 + $0x1f8] sm:$0xff] }
 0x71d   : > { %2416 = vmatprep.mubr.f32.mxu1 %v2281_v4  ;;  %v2316_v4 = vld [vmem:[%s3730_s13 + $0x100] sm:$0xff] }
 0x71e   : > { %2417 = vmatmul.mubr.f32.vlgmr.msra.gmra.mrb[20].mxu1 %v2280_v5  ;;  %v2317_v5 = vld [vmem:[%s3730_s13 + $0x108] sm:$0xff] }
 0x763   : > { %v1911_v7 = vpop.permute.xlu0 %1910  ;;  %v1915_v10 = vpop.permute.xlu1 %1914 }
 0x764   : > { %v1921_v12 = vsel %vm1118_vm1, %v1905_v46, %v1911_v7  ;;  %v2064_v46 = vld [vmem:[%s3728_s18 + $0x130] sm:$0xff]  ;;  %v3115_v7 = vpack.c.bf16 %v2317_v5, %v2316_v4 }
 0x765   : > { %v1923_v18 = vsel %vm1922_vm4, %v1921_v12, %v1915_v10  ;;  %v3067_v49 = vpack.c.bf16 %v2064_v46, %v2060_v45  ;;  %v3117_v10 = vpack.c.bf16 %v2335_v9, %v2334_v8  ;;  %v2318_v12 = vld [vmem:[%s3730_s13 + $0x110] sm:$0xff]  ;;  %v2345_v45 = vld [vmem:[%s3730_s13 + $0x1e8] sm:$0xff] }
 0x767   : > { %v1919_v17 = vpop.permute.xlu0 %1918 }
 0x768   : > { %v1925_v16 = vsel %vm1924_vm5, %v1923_v18, %v1919_v17  ;;  %v2320_v18 = vld [vmem:[%s3730_s13 + $0x120] sm:$0xff] }
 0x769   : > { %2935 = vmatmul.mubr.f32.vlgmr.msra.gmra.mrb[2].mxu0 %v1925_v16  ;;  %v2339_v16 = vld [vmem:[%s3730_s13 + $0x1b8] sm:$0xff] }
 0x76a   : > { %3052 = vmatpush1.bf16.msra.mxu0 %v3051_v38  ;;  %2241 = vmatprep.mubr.f32.mxu0 %v3460_v59  ;;  %v2065_v59 = vld [vmem:[%s3728_s18 + $0x138] sm:$0xff]  ;;  %v2337_v38 = vld [vmem:[%s3730_s13 + $0x1a8] sm:$0xff]  ;;  %v3125_v22 = vpack.c.bf16 %v2339_v16, %v2338_v20  ;;  %v2350_v16 = vsub.s32 7, %v3816_v23 }
 0x76b   : > { %3054 = vmatprep.subr.bf16.mxu0 %v3053_v13  ;;  %v3065_v44 = vpack.c.bf16 %v2065_v59, %v2061_v25  ;;  %v3121_v17 = vpack.c.bf16 %v2337_v38, %v2336_v34  ;;  %v2321_v13 = vld [vmem:[%s3730_s13 + $0x128] sm:$0xff]  ;;  %v2326_v59 = vld [vmem:[%s3730_s13 + $0x150] sm:$0xff] }
 0x76c   : > { %v3123_v19 = vpack.c.bf16 %v2321_v13, %v2320_v18 }
 0x76e   : > { %3056 = vmatpush1.bf16.msra.mxu0 %v3055_v31  ;;  %v2323_v31 = vld [vmem:[%s3730_s13 + $0x138] sm:$0xff] }
 0x76f   : > { %3058 = vmatprep.subr.bf16.mxu0 %v3057_v32  ;;  %v3127_v32 = vpack.c.bf16 %v2323_v31, %v2322_v28  ;;  %v2351_v28 = vrot.slane %v4111_v47, %v2350_v16 }
 0x772   : > { %3060 = vmatpush1.bf16.msra.mxu0 %v3059_v41  ;;  %v2325_v41 = vld [vmem:[%s3730_s13 + $0x148] sm:$0xff] }
 0x773   : > { %3062 = vmatprep.subr.bf16.mxu0 %v3061_v42  ;;  %v2342_v42 = vld [vmem:[%s3730_s13 + $0x1d0] sm:$0xff]  ;;  %v3131_v29 = vpack.c.bf16 %v2325_v41, %v2324_v39 }
 0x774   : > { %v3133_v25 = vpack.c.bf16 %v2343_v27, %v2342_v42  ;;  %v3252_v27 = vld [vmem:[#allocation2] sm:$0xff] }
 0x776   : > { %3064 = vmatpush1.bf16.msra.mxu0 %v3063_v43  ;;  %v2327_v43 = vld [vmem:[%s3730_s13 + $0x158] sm:$0xff] }
 0x777   : > { %3066 = vmatprep.subr.bf16.mxu0 %v3065_v44  ;;  %v2344_v44 = vld [vmem:[%s3730_s13 + $0x1e0] sm:$0xff]  ;;  %v3135_v46 = vpack.c.bf16 %v2327_v43, %v2326_v59 }
 0x778   : > { %v3137_v48 = vpack.c.bf16 %v2345_v45, %v2344_v44 }
 0x77a   : > { %3068 = vmatpush1.bf16.msra.mxu0 %v3067_v49  ;;  %v2329_v49 = vld [vmem:[%s3730_s13 + $0x168] sm:$0xff] }
 0x77b   : > { %3070 = vmatprep.subr.bf16.mxu0 %v3069_v30  ;;  %v2346_v30 = vld [vmem:[%s3730_s13 + $0x1f0] sm:$0xff]  ;;  %v3139_v52 = vpack.c.bf16 %v2329_v49, %v2328_v15 }
 0x77e   : > { %3072 = vmatpush1.bf16.msra.mxu0 %v3071_v21  ;;  %v3141_v21 = vpack.c.bf16 %v2347_v50, %v2346_v30  ;;  %v2518_v30 = vrot.slane (!%p2698_p5), %v3748_v2, %v458_v26 }
 0x77f   : > { %3074 = vmatprep.subr.bf16.mxu0 %v3073_v54  ;;  %v2330_v54 = vld [vmem:[%s3730_s13 + $0x170] sm:$0xff] }
 0x780   : > { %v3143_v57 = vpack.c.bf16 %v2331_v55, %v2330_v54 }
 0x782   : > { %3076 = vmatpush1.bf16.msra.mxu0 %v3075_v60 }
 0x783   : > { %3078 = vmatprep.subr.bf16.mxu0 %v3077_v61  ;;  %v432_v61 = vld [vmem:[%s3741_s17 + $0x18] sm:$0xff] }
 0x784   : > { %v2105_v33 = vrot.slane %v432_v61, %v4108_v11 }
 0x786   : > { %3080 = vmatpush1.bf16.msra.mxu0 %v3079_v63 }
 0x787   : > { %3114 = vmatprep.subr.bf16.mxu0 %v3113_v3 }
 0x789   : > { %2242 = vmatmul.mubr.f32.vlgmr.msra.gmra.mrb[4].mxu0 %v4028_v36  ;;  %v2319_v36 = vld [vmem:[%s3730_s13 + $0x118] sm:$0xff] }
 0x78a   : > { %3116 = vmatpush3.bf16.msra.mxu0 %v3115_v7  ;;  %v3119_v14 = vpack.c.bf16 %v2319_v36, %v2318_v12 }
 0x78b   : > { %3118 = vmatprep.subr.bf16.mxu0 %v3117_v10 }
 0x78e   : > { %3120 = vmatpush3.bf16.msra.mxu0 %v3119_v14 }
 0x78f   : > { %3122 = vmatprep.subr.bf16.mxu0 %v3121_v17 }
 0x792   : > { %3124 = vmatpush3.bf16.msra.mxu0 %v3123_v19 }
 0x793   : > { %3126 = vmatprep.subr.bf16.mxu0 %v3125_v22  ;;  %v1944_v22 = vsub.s32 5, %v3816_v23 }
 0x795   : > { %v1945_v31 = vrot.slane %v4111_v47, %v1944_v22 }
 0x796   : > { %3128 = vmatpush3.bf16.msra.mxu0 %v3127_v32 }
 0x797   : > { %3130 = vmatprep.subr.bf16.mxu0 %v3129_v40 }
 0x79a   : > { %3132 = vmatpush3.bf16.msra.mxu0 %v3131_v29 }
 0x79b   : > { %3134 = vmatprep.subr.bf16.mxu0 %v3133_v25 }
 0x79e   : > { %3136 = vmatpush3.bf16.msra.mxu0 %v3135_v46 }
 0x79f   : > { %3138 = vmatprep.subr.bf16.mxu0 %v3137_v48  ;;  %v2513_v48 = vrot.slane (!%p2698_p5), %v3748_v2, %v453_v24 }
 0x7a2   : > { %3140 = vmatpush3.bf16.msra.mxu0 %v3139_v52 }
 0x7a3   : > { %3142 = vmatprep.subr.bf16.mxu0 %v3141_v21 }
 0x7a6   : > { %3144 = vmatpush3.bf16.msra.mxu0 %v3143_v57 }
 0x7f1   : > { %v2789_v51 = vpop.f32.mrb[20].mxu1 }
 0x7f2   : > { %v2790_v53 = vpop.f32.mrb[21].mxu1 }
 0x7f3   : > { %v2791_v56 = vadd.f32 %v2790_v53, %v2789_v51 }
 0x7f5   : > { %v2419_v37 = vadd.f32 %v2791_v56, %v2351_v28 }
 0x83c   : > { %v2012_v58 = vpop.f32.mrb[2].mxu0 }
 0x83d   : > { %v2936_v60 = vpop.f32.mrb[3].mxu0  ;;  %v2013_v40 = vadd.f32 %v2012_v58, %v1945_v31 }
 0x85c   : > { %v2243_v63 = vpop.f32.mrb[4].mxu0 }
 0x85d   : > { %v2244_v0 = vadd.f32 %v2243_v63, %v2101_v62  ;;  %v2245_v6 = vpop.f32.mrb[5].mxu0 }
 0x85e   : > { %v2246_v3 = vadd.f32 %v2245_v6, %v2105_v33 }
 0x85f   : > { %v2250_v4 = vmul.f32 %v2244_v0, %v2244_v0 }
 0x860   : > { %v2251_v5 = vmul.f32 %v2246_v3, %v2246_v3 }
 0x861   : > { %v2254_v7 = vmul.f32 %v2250_v4, %v2244_v0 }
 0x862   : > { %v2255_v8 = vmul.f32 %v2251_v5, %v2246_v3 }
 0x863   : > { %v2258_v9 = vmul.f32 0.044715, %v2254_v7 }
 0x864   : > { %v2259_v10 = vmul.f32 0.044715, %v2255_v8 }
 0x865   : > { %v2262_v12 = vadd.f32 %v2258_v9, %v2244_v0 }
 0x866   : > { %v2263_v36 = vadd.f32 %v2259_v10, %v2246_v3 }
 0x867   : > { %v2266_v14 = vmul.f32 0.7978846, %v2262_v12 }
 0x868   : > { %v2267_v34 = vmul.f32 0.7978846, %v2263_v36 }
 0x869   : > { %3247 = vtanh.f32 %v2266_v14 }
 0x86a   : > { %3249 = vtanh.f32 %v2267_v34 }
 0x873   : > { %v3248_v38 = vpop.eup %3247 }
 0x874   : > { %v3250_v1 = vpop.eup %3249  ;;  %v2274_v17 = vadd.f32 1.0, %v3248_v38 }
 0x875   : > { %v2275_v11 = vadd.f32 1.0, %v3250_v1 }
 0x876   : > { %v2278_v18 = vmul.f32 0.5, %v2274_v17 }
 0x877   : > { %v2279_v13 = vmul.f32 0.5, %v2275_v11 }
 0x878   : > { %v2282_v20 = vmul.f32 %v2278_v18, %v2244_v0 }
 0x879   : > { %v2283_v19 = vmul.f32 %v2279_v13, %v2246_v3 }
 0x87b   : > { %2486 = vmatprep.mubr.f32.mxu0 %v2283_v19 }
 0x87c   : > { %2487 = vmatmul.mubr.f32.vlgmr.msra.gmra.mrb[6].mxu0 %v2282_v20 }
 0x94f   : > { %v2824_v32 = vpop.f32.mrb[6].mxu0 }
 0x950   : > { %v2825_v35 = vpop.f32.mrb[7].mxu0 }
 0x951   : > { %v2826_v39 = vadd.f32 %v2825_v35, %v2824_v32 }
 0x953   : > { %v2489_v41 = vadd.f32 %v2826_v39, %v2419_v37  ;;  %2498 = sbr.rel (%p2698_p5) target bundleno = 2705 (0xa91), region = 72 }
 0x955   : > { %v2492_v42 = vadd.f32 %v2489_v41, %v2013_v40 }
 0x957   : > { %v2493_v29 = vadd.f32 %v3252_v27, %v2492_v42 }
 0x959   : > { %2494 = vst [vmem:[#allocation2] sm:$0xff] %v2493_v29  ;;  %2499 = vadd.xlane.f32.xlu0 (!%p2698_p5), %v2493_v29 }
 0x9e6   : > { %v2500_v25 = vpop.xlane.xlu0 %2499 }
 0x9e7   : > { %v2501_v59 = vmul.f32 0.0078125, %v2500_v25 }
 0x9e9   : > { %v2502_v43 = vsub.f32 %v2493_v29, %v2501_v59 }
 0x9eb   : > { %v2503_v44 = vmul.f32 %v2502_v43, %v2502_v43 }
 0x9ed   : > { %2504 = vadd.xlane.f32.xlu0 %v2503_v44 }
 0xa7a   : > { %v2505_v47 = vpop.xlane.xlu0 %2504 }
 0xa7b   : > { %v2506_v45 = vmul.f32 0.0078125, %v2505_v47 }
 0xa7d   : > { %v2507_v46 = vadd.f32 1e-05, %v2506_v45 }
 0xa7f   : > { %3253 = vrsqrt.f32 %v2507_v46 }
 0xa89   : > { %v3254_v15 = vpop.eup %3253 }
 0xa8a   : > { %v2509_v49 = vmul.f32 %v3254_v15, %v2502_v43 }
 0xa8c   : > { %v2514_v50 = vmul.f32 %v2513_v48, %v2509_v49 }
 0xa8e   : > { %v2519_v51 = vadd.f32 %v2518_v30, %v2514_v50 }
 0xa90   : > { %2520 = vst [vmem:[#allocation11] sm:$0xff] %v2519_v51 }
 0xa91 PF: > { %p3174_p6 = scmp.eq.s32.totalorder %s3529_s28, 1  ;;  %s3469_s22 = smov [#allocation11]  }
 0xa92   : > { %s2528_s18 = sshll.u32 %s3469_s22, 4  ;;  %s2529_s18 = int_to_ptr.vmem [resolvable:$true] %s2528_s18 }
 0xa93   : > { %s3375_s13 = scalar_lea.vmem %s2529_s18, 128  ;;  %p3382_p13 = scmp.lt.s32.totalorder %s2529_s18, %s2529_s18 }
 0xa94   : > { %p3376_p1 = scmp.ne.s32.totalorder %s2529_s18, %s3375_s13  ;;  %p3383_p9 = scmp.lt.s32.totalorder %s3375_s13, %s3375_s13 }
 0xa96   : > { %p3377_p4 = pnand %p3376_p1, %p3174_p6  ;;  %p3384_p0 = por %p3383_p9, %p3382_p13 }
 0xa98   : > { %p3378_p11 = pneg %p3377_p4 }
 0xa9a   : > { %p3385_p12 = pnand %p3384_p0, %p3378_p11 }
 0xa9c   : > { %3388 = shalt.err (!%p3385_p12)
}
 0xa9d   : > { %s3389_s19 = scalar_lea.hbm %s4240_s7, 128 }
 0xa9e   : > { %p3390_p2 = scmp.ne.s32.totalorder %s4240_s7, %s3389_s19  ;;  %p3395_p8 = scmp.lt.u32.totalorder %s3389_s19, %s4240_s7 }
 0xaa0   : > { %p3391_p10 = pnand %p3390_p2, %p3174_p6 }
 0xaa2   : > { %p3392_p7 = pneg %p3391_p10 }
 0xaa4   : > { %p3397_p3 = pnand %p3395_p8, %p3392_p7 }
 0xaa6   : > { %3400 = shalt.err (!%p3397_p3)
}
 0xaa7   : > { %3157 = dma.vmem_to_hbm [thread:$0]  (%p3174_p6), %s2529_s18, 128, %s4240_s7, [#allocation5]  }
 0xaa8   : > { %3430 = dma.done.wait (%p3174_p6), [#allocation5], 128  }
 0xaa9   : > { %3432 = vsyncadd (%p3174_p6), [#allocation5], 4294967168 }
 0xaaa PF: > { %p24_p5 = scmp.ge.s32.totalorder %s3532_s29, 4   ;;  %s4256_s24 = smov %s3439_s25 }
 0xaab   : > { %s4257_s25 = smov %s3443_s26  ;;  %s4258_s26 = smov %s3542_s9 }
 0xaac   : > { %s4259_s27 = smov %s3532_s29  ;;  %26 = sbr.rel (!%p24_p5) target bundleno = 11 (0xb), region = 135 }
 0xab3   :  { %2541 = vsyncpa [#allocation4], 1 }
 0xab4   :  { %2543 = vsyncpa [#allocation4 + $0x1], 1 }
 0xab5   :  { %2544 = vsyncpa [#allocation7], 1 }
 0xab6   :  { %2546 = vsyncpa [#allocation7 + $0x1], 1 }
 0xab7   :  { %2547 = vsyncpa [#allocation10], 1 }
 0xab8   :  { %2549 = vsyncpa [#allocation10 + $0x1], 1 }
 0xab9   :  { %2550 = vsyncpa [#allocation5], 1 }
 0xaba   :  { %2552 = vsyncpa [#allocation5 + $0x1], 1 }

</bundles_post_ra>
